<compile_context>
chip_gen: v7x
topology: tpu7x:2x2x1
jax: 0.10.0
libtpu: 0.0.40
codegen_flags: <defaults>
</compile_context>

<pallas_src>
import jax
import jax.numpy as jnp
from jax.experimental import pallas as pl
from jax.experimental.pallas import tpu as pltpu


def _round_up(v, m):
    return (v + m - 1) // m * m


def _make_resblock_kernel(N, C, W, Wp, M, Lout, Lp, starts):
    """Fused residual block; the whole batch runs in one pallas invocation."""
    inv_wp = 1.0 / Wp

    def kernel(x_ref, w1_ref, b1_ref, w2_ref, b2_ref, o_ref, s_ref, hp_ref):
        # x_ref : (N, C, Lp)    zero-padded flat images, interior at lanes [M, M+Lout)
        # w*_ref: (C, 9*C)      w[co, t*C + ci], tap t = kh*3 + kw
        # b*_ref: (C, 1)
        # o_ref : (N, C, Lout)
        # s_ref : (9*C, N*Lout) stacked shifted-window operand (reused for both convs)
        # hp_ref: (N, C, Lp)    zero-padded relu(conv1(...)) used as conv2's input

        # Interior-column mask (1.0 at padded cols w in [1, W], 0.0 at h-padding cols),
        # built in-kernel.  Lout % Wp == 0, so flat_lane % Wp is the padded column
        # index even across the batch stack; float floor avoids integer div lowering.
        lane = jax.lax.broadcasted_iota(jnp.int32, (1, N * Lout), 1).astype(jnp.float32)
        col = lane - jnp.floor(lane * inv_wp) * Wp
        mask = jnp.logical_and(col > 0.5, col < W + 0.5).astype(jnp.float32)

        # Zero only the margins of conv2's padded buffer (interior is overwritten
        # below).  Both margins are 128-lane aligned dense stores.
        for n in range(N):
            hp_ref[n, :, 0:M] = jnp.zeros((C, M), jnp.float32)
            hp_ref[n, :, M + Lout:Lp] = jnp.zeros((C, Lp - M - Lout), jnp.float32)

        # conv1: build the stacked (9C, N*Lout) operand with ReLU fused into the
        # shifted-window copies, then a single K=9C MXU dot (instead of 9 K=C dots).
        for n in range(N):
            for t in range(9):
                s = starts[t]
                s_ref[t * C:(t + 1) * C, n * Lout:(n + 1) * Lout] = jnp.maximum(
                    x_ref[n, :, s:s + Lout], 0.0)
        h = jnp.dot(w1_ref[...], s_ref[...], preferred_element_type=jnp.float32)
        h = jnp.maximum(h + b1_ref[...], 0.0) * mask   # ReLU + zero h-padding columns

        # Re-embed as conv2's zero-padded input (interior store is lane-aligned).
        for n in range(N):
            hp_ref[n, :, M:M + Lout] = h[:, n * Lout:(n + 1) * Lout]

        # conv2: stacked operand again (already ReLU'd / masked), single dot.
        for n in range(N):
            for t in range(9):
                s = starts[t]
                s_ref[t * C:(t + 1) * C, n * Lout:(n + 1) * Lout] = hp_ref[n, :, s:s + Lout]
        y = jnp.dot(w2_ref[...], s_ref[...], preferred_element_type=jnp.float32) + b2_ref[...]

        # Residual add of the ORIGINAL (un-ReLU'd) x; aligned loads and stores.
        for n in range(N):
            o_ref[n, :, :] = y[:, n * Lout:(n + 1) * Lout] + x_ref[n, :, M:M + Lout]

    return kernel


def residual_block(x, w1, b1, w2, b2):
    """out = conv2(relu(conv1(relu(x)))) + x with 3x3/s1/p1 convs.  NCHW in/out.

    w1, w2: (9, C, C) with tap index t = kh*3 + kw and per-tap layout [co, ci].
    """
    N, C, H, W = x.shape
    Wp = _round_up(W + 2, 8)        # padded width (extra right cols stay zero/masked)
    Lout = H * Wp                   # flat interior: padded rows 1..H, all Wp columns
    M = 128                         # left margin -> interior window is 128-lane aligned
    assert M >= Wp + 1, "left margin must cover one padded row plus one tap element"
    Lp = _round_up(M + Lout + Wp + 1, 128)

    x = x.astype(jnp.float32)
    xp = jnp.pad(x, ((0, 0), (0, 0), (1, 1), (1, Wp - W - 1)))             # (N,C,H+2,Wp)
    flat = xp.reshape(N, C, (H + 2) * Wp)
    xb = jnp.pad(flat, ((0, 0), (0, 0),
                        (M - Wp, Lp - (M - Wp) - (H + 2) * Wp)))           # (N,C,Lp)

    # Tap t = kh*3+kw: flat offset of its shifted window relative to lane 0.
    starts = tuple(M + (kh - 1) * Wp + (kw - 1) for kh in range(3) for kw in range(3))

    def stack_w(w):    # (9, Co, Ci) -> (Co, 9*Ci), matching the stacked operand rows
        return jnp.transpose(w.astype(jnp.float32), (1, 0, 2)).reshape(C, 9 * C)

    kernel = _make_resblock_kernel(N, C, W, Wp, M, Lout, Lp, starts)

    # Whole batch in ONE grid step: at these sizes per-step overhead dominates and
    # lane-stacking the batch lengthens the MXU stream per weight push.
    # (On a v7x megacore, grid=(N,) with dimension_semantics=("parallel",) and one
    #  sample per TensorCore is the alternative layout.)
    out_flat = pl.pallas_call(
        kernel,
        grid=(1,),
        in_specs=[
            pl.BlockSpec((N, C, Lp), lambda i: (0, 0, 0)),       # x (flat padded)
            pl.BlockSpec((C, 9 * C), lambda i: (0, 0)),          # w1 stacked
            pl.BlockSpec((C, 1), lambda i: (0, 0)),              # b1
            pl.BlockSpec((C, 9 * C), lambda i: (0, 0)),          # w2 stacked
            pl.BlockSpec((C, 1), lambda i: (0, 0)),              # b2
        ],
        out_specs=pl.BlockSpec((N, C, Lout), lambda i: (0, 0, 0)),
        out_shape=jax.ShapeDtypeStruct((N, C, Lout), jnp.float32),
        scratch_shapes=[pltpu.VMEM((9 * C, N * Lout), jnp.float32),   # stacked operand
                        pltpu.VMEM((N, C, Lp), jnp.float32)],         # conv2 padded in
    )(xb, stack_w(w1), b1.reshape(C, 1).astype(jnp.float32),
      stack_w(w2), b2.reshape(C, 1).astype(jnp.float32))

    # Glue: drop horizontal padding columns, back to NCHW.  (If the consumer can take
    # the padded (N, C, H, Wp) layout, this slice / extra HBM round-trip can be elided.)
    return out_flat.reshape(N, C, H, Wp)[:, :, :, 1:1 + W]


def _reference(x, w1, b1, w2, b2):
    """Pure-JAX reference (lax conv) matching the PyTorch module."""
    C = x.shape[1]

    def to_oihw(w):  # (9, Co, Ci) with t = kh*3+kw  ->  (Co, Ci, kh, kw)
        return jnp.transpose(w.reshape(3, 3, C, C), (2, 3, 0, 1))

    def conv(h, w, b):
        y = jax.lax.conv_general_dilated(
            h, to_oihw(w), (1, 1), ((1, 1), (1, 1)),
            dimension_numbers=("NCHW", "OIHW", "NCHW"),
            precision=jax.lax.Precision.HIGHEST)
        return y + b.reshape(1, C, 1, 1)

    h = conv(jax.nn.relu(x), w1, b1)
    return conv(jax.nn.relu(h), w2, b2) + x


if __name__ == "__main__":
    key = jax.random.PRNGKey(0)
    kx, kw1, kb1, kw2, kb2 = jax.random.split(key, 5)

    N, C, H, W = 2, 16, 16, 16          # small shapes consistent with ResidualBlock(C)
    x = jax.random.normal(kx, (N, C, H, W), jnp.float32)
    scale = (2.0 / (9 * C)) ** 0.5
    w1 = jax.random.normal(kw1, (9, C, C), jnp.float32) * scale   # [kh*3+kw][co, ci]
    b1 = jax.random.normal(kb1, (C,), jnp.float32) * 0.1
    w2 = jax.random.normal(kw2, (9, C, C), jnp.float32) * scale
    b2 = jax.random.normal(kb2, (C,), jnp.float32) * 0.1

    fn = jax.jit(residual_block)
    out = fn(x, w1, b1, w2, b2)
    jax.block_until_ready(out)

    ref = _reference(x, w1, b1, w2, b2)
    assert out.shape == (N, C, H, W)
    assert bool(jnp.all(jnp.isfinite(out)))
    max_err = float(jnp.max(jnp.abs(out - ref)))
    assert max_err < 1e-2, f"max abs err vs reference: {max_err}"

    print("KERNEL_OK")
</pallas_src>

<mosaic_0001>
module attributes {stable_mosaic.version = 11 : i64} {
  func.func @kernel(%arg0: i32, %arg1: memref<2x16x640xf32, #tpu.memory_space<vmem>>, %arg2: memref<16x144xf32, #tpu.memory_space<vmem>>, %arg3: memref<16x1xf32, #tpu.memory_space<vmem>>, %arg4: memref<16x144xf32, #tpu.memory_space<vmem>>, %arg5: memref<16x1xf32, #tpu.memory_space<vmem>>, %arg6: memref<2x16x384xf32, #tpu.memory_space<vmem>>, %arg7: memref<144x768xf32, #tpu.memory_space<vmem>>, %arg8: memref<2x16x640xf32, #tpu.memory_space<vmem>>) attributes {dimension_semantics = [#tpu.dimension_semantics<arbitrary>], iteration_bounds = array<i64: 1>, scalar_prefetch = 0 : i64, scratch_operands = 2 : i64, tpu.core_type = #tpu.core_type<tc>, window_params = [{pipeline_mode = #tpu.pipeline_mode<synchronous>, transform_indices = @transform_0, window_bounds = array<i64: 2, 16, 640>}, {pipeline_mode = #tpu.pipeline_mode<synchronous>, transform_indices = @transform_1, window_bounds = array<i64: 16, 144>}, {pipeline_mode = #tpu.pipeline_mode<synchronous>, transform_indices = @transform_2, window_bounds = array<i64: 16, 1>}, {pipeline_mode = #tpu.pipeline_mode<synchronous>, transform_indices = @transform_3, window_bounds = array<i64: 16, 144>}, {pipeline_mode = #tpu.pipeline_mode<synchronous>, transform_indices = @transform_4, window_bounds = array<i64: 16, 1>}, {pipeline_mode = #tpu.pipeline_mode<synchronous>, transform_indices = @transform_5, window_bounds = array<i64: 2, 16, 384>}]} {
    %0 = tpu.iota {dimensions = array<i32: 1>} : vector<1x768xi32>
    %1 = arith.sitofp %0 : vector<1x768xi32> to vector<1x768xf32>
    %cst = arith.constant 0.0416666679 : f32
    %2 = vector.broadcast %cst : f32 to vector<1x768xf32>
    %3 = arith.mulf %1, %2 : vector<1x768xf32>
    %4 = math.floor %3 : vector<1x768xf32>
    %cst_0 = arith.constant 2.400000e+01 : f32
    %5 = vector.broadcast %cst_0 : f32 to vector<1x768xf32>
    %6 = arith.mulf %4, %5 : vector<1x768xf32>
    %7 = arith.subf %1, %6 : vector<1x768xf32>
    %cst_1 = arith.constant 5.000000e-01 : f32
    %8 = vector.broadcast %cst_1 : f32 to vector<1x768xf32>
    %9 = arith.cmpf ogt, %7, %8 : vector<1x768xf32>
    %cst_2 = arith.constant 1.650000e+01 : f32
    %10 = vector.broadcast %cst_2 : f32 to vector<1x768xf32>
    %11 = arith.cmpf olt, %7, %10 : vector<1x768xf32>
    %12 = arith.andi %9, %11 : vector<1x768xi1>
    %13 = arith.extui %12 : vector<1x768xi1> to vector<1x768xi32>
    %14 = arith.sitofp %13 : vector<1x768xi32> to vector<1x768xf32>
    %cst_3 = arith.constant 0.000000e+00 : f32
    %15 = vector.broadcast %cst_3 : f32 to vector<16x128xf32>
    %c0 = arith.constant 0 : index
    %c0_4 = arith.constant 0 : index
    %c0_5 = arith.constant 0 : index
    %16 = vector.load %arg8[%c0, %c0_4, %c0_5] : memref<2x16x640xf32, #tpu.memory_space<vmem>>, vector<1x16x128xf32>
    %17 = vector.shape_cast %16 : vector<1x16x128xf32> to vector<16x128xf32>
    %18 = vector.shape_cast %15 : vector<16x128xf32> to vector<1x16x128xf32>
    tpu.vector_store %arg8[%c0, %c0_4, %c0_5], %18 {strides = array<i32>} : memref<2x16x640xf32, #tpu.memory_space<vmem>>, vector<1x16x128xf32>,
    %cst_6 = arith.constant 0.000000e+00 : f32
    %19 = vector.broadcast %cst_6 : f32 to vector<16x128xf32>
    %c0_7 = arith.constant 0 : index
    %c0_8 = arith.constant 0 : index
    %c512 = arith.constant 512 : index
    %20 = vector.load %arg8[%c0_7, %c0_8, %c512] : memref<2x16x640xf32, #tpu.memory_space<vmem>>, vector<1x16x128xf32>
    %21 = vector.shape_cast %20 : vector<1x16x128xf32> to vector<16x128xf32>
    %22 = vector.shape_cast %19 : vector<16x128xf32> to vector<1x16x128xf32>
    tpu.vector_store %arg8[%c0_7, %c0_8, %c512], %22 {strides = array<i32>} : memref<2x16x640xf32, #tpu.memory_space<vmem>>, vector<1x16x128xf32>,
    %cst_9 = arith.constant 0.000000e+00 : f32
    %23 = vector.broadcast %cst_9 : f32 to vector<16x128xf32>
    %c1 = arith.constant 1 : index
    %c0_10 = arith.constant 0 : index
    %c0_11 = arith.constant 0 : index
    %24 = vector.load %arg8[%c1, %c0_10, %c0_11] : memref<2x16x640xf32, #tpu.memory_space<vmem>>, vector<1x16x128xf32>
    %25 = vector.shape_cast %24 : vector<1x16x128xf32> to vector<16x128xf32>
    %26 = vector.shape_cast %23 : vector<16x128xf32> to vector<1x16x128xf32>
    tpu.vector_store %arg8[%c1, %c0_10, %c0_11], %26 {strides = array<i32>} : memref<2x16x640xf32, #tpu.memory_space<vmem>>, vector<1x16x128xf32>,
    %cst_12 = arith.constant 0.000000e+00 : f32
    %27 = vector.broadcast %cst_12 : f32 to vector<16x128xf32>
    %c1_13 = arith.constant 1 : index
    %c0_14 = arith.constant 0 : index
    %c512_15 = arith.constant 512 : index
    %28 = vector.load %arg8[%c1_13, %c0_14, %c512_15] : memref<2x16x640xf32, #tpu.memory_space<vmem>>, vector<1x16x128xf32>
    %29 = vector.shape_cast %28 : vector<1x16x128xf32> to vector<16x128xf32>
    %30 = vector.shape_cast %27 : vector<16x128xf32> to vector<1x16x128xf32>
    tpu.vector_store %arg8[%c1_13, %c0_14, %c512_15], %30 {strides = array<i32>} : memref<2x16x640xf32, #tpu.memory_space<vmem>>, vector<1x16x128xf32>,
    %c0_16 = arith.constant 0 : index
    %c0_17 = arith.constant 0 : index
    %c103 = arith.constant 103 : index
    %31 = vector.load %arg1[%c0_16, %c0_17, %c103] : memref<2x16x640xf32, #tpu.memory_space<vmem>>, vector<1x16x384xf32>
    %32 = vector.shape_cast %31 : vector<1x16x384xf32> to vector<16x384xf32>
    %cst_18 = arith.constant 0.000000e+00 : f32
    %33 = vector.broadcast %cst_18 : f32 to vector<16x384xf32>
    %34 = arith.maximumf %32, %33 : vector<16x384xf32>
    %c0_19 = arith.constant 0 : index
    %c0_20 = arith.constant 0 : index
    %35 = vector.load %arg7[%c0_19, %c0_20] : memref<144x768xf32, #tpu.memory_space<vmem>>, vector<16x384xf32>
    tpu.vector_store %arg7[%c0_19, %c0_20], %34 {strides = array<i32>} : memref<144x768xf32, #tpu.memory_space<vmem>>, vector<16x384xf32>,
    %c0_21 = arith.constant 0 : index
    %c0_22 = arith.constant 0 : index
    %c104 = arith.constant 104 : index
    %36 = vector.load %arg1[%c0_21, %c0_22, %c104] : memref<2x16x640xf32, #tpu.memory_space<vmem>>, vector<1x16x384xf32>
    %37 = vector.shape_cast %36 : vector<1x16x384xf32> to vector<16x384xf32>
    %cst_23 = arith.constant 0.000000e+00 : f32
    %38 = vector.broadcast %cst_23 : f32 to vector<16x384xf32>
    %39 = arith.maximumf %37, %38 : vector<16x384xf32>
    %c16 = arith.constant 16 : index
    %c0_24 = arith.constant 0 : index
    %40 = vector.load %arg7[%c16, %c0_24] : memref<144x768xf32, #tpu.memory_space<vmem>>, vector<16x384xf32>
    tpu.vector_store %arg7[%c16, %c0_24], %39 {strides = array<i32>} : memref<144x768xf32, #tpu.memory_space<vmem>>, vector<16x384xf32>,
    %c0_25 = arith.constant 0 : index
    %c0_26 = arith.constant 0 : index
    %c105 = arith.constant 105 : index
    %41 = vector.load %arg1[%c0_25, %c0_26, %c105] : memref<2x16x640xf32, #tpu.memory_space<vmem>>, vector<1x16x384xf32>
    %42 = vector.shape_cast %41 : vector<1x16x384xf32> to vector<16x384xf32>
    %cst_27 = arith.constant 0.000000e+00 : f32
    %43 = vector.broadcast %cst_27 : f32 to vector<16x384xf32>
    %44 = arith.maximumf %42, %43 : vector<16x384xf32>
    %c32 = arith.constant 32 : index
    %c0_28 = arith.constant 0 : index
    %45 = vector.load %arg7[%c32, %c0_28] : memref<144x768xf32, #tpu.memory_space<vmem>>, vector<16x384xf32>
    tpu.vector_store %arg7[%c32, %c0_28], %44 {strides = array<i32>} : memref<144x768xf32, #tpu.memory_space<vmem>>, vector<16x384xf32>,
    %c0_29 = arith.constant 0 : index
    %c0_30 = arith.constant 0 : index
    %c127 = arith.constant 127 : index
    %46 = vector.load %arg1[%c0_29, %c0_30, %c127] : memref<2x16x640xf32, #tpu.memory_space<vmem>>, vector<1x16x384xf32>
    %47 = vector.shape_cast %46 : vector<1x16x384xf32> to vector<16x384xf32>
    %cst_31 = arith.constant 0.000000e+00 : f32
    %48 = vector.broadcast %cst_31 : f32 to vector<16x384xf32>
    %49 = arith.maximumf %47, %48 : vector<16x384xf32>
    %c48 = arith.constant 48 : index
    %c0_32 = arith.constant 0 : index
    %50 = vector.load %arg7[%c48, %c0_32] : memref<144x768xf32, #tpu.memory_space<vmem>>, vector<16x384xf32>
    tpu.vector_store %arg7[%c48, %c0_32], %49 {strides = array<i32>} : memref<144x768xf32, #tpu.memory_space<vmem>>, vector<16x384xf32>,
    %c0_33 = arith.constant 0 : index
    %c0_34 = arith.constant 0 : index
    %c128 = arith.constant 128 : index
    %51 = vector.load %arg1[%c0_33, %c0_34, %c128] : memref<2x16x640xf32, #tpu.memory_space<vmem>>, vector<1x16x384xf32>
    %52 = vector.shape_cast %51 : vector<1x16x384xf32> to vector<16x384xf32>
    %cst_35 = arith.constant 0.000000e+00 : f32
    %53 = vector.broadcast %cst_35 : f32 to vector<16x384xf32>
    %54 = arith.maximumf %52, %53 : vector<16x384xf32>
    %c64 = arith.constant 64 : index
    %c0_36 = arith.constant 0 : index
    %55 = vector.load %arg7[%c64, %c0_36] : memref<144x768xf32, #tpu.memory_space<vmem>>, vector<16x384xf32>
    tpu.vector_store %arg7[%c64, %c0_36], %54 {strides = array<i32>} : memref<144x768xf32, #tpu.memory_space<vmem>>, vector<16x384xf32>,
    %c0_37 = arith.constant 0 : index
    %c0_38 = arith.constant 0 : index
    %c129 = arith.constant 129 : index
    %56 = vector.load %arg1[%c0_37, %c0_38, %c129] : memref<2x16x640xf32, #tpu.memory_space<vmem>>, vector<1x16x384xf32>
    %57 = vector.shape_cast %56 : vector<1x16x384xf32> to vector<16x384xf32>
    %cst_39 = arith.constant 0.000000e+00 : f32
    %58 = vector.broadcast %cst_39 : f32 to vector<16x384xf32>
    %59 = arith.maximumf %57, %58 : vector<16x384xf32>
    %c80 = arith.constant 80 : index
    %c0_40 = arith.constant 0 : index
    %60 = vector.load %arg7[%c80, %c0_40] : memref<144x768xf32, #tpu.memory_space<vmem>>, vector<16x384xf32>
    tpu.vector_store %arg7[%c80, %c0_40], %59 {strides = array<i32>} : memref<144x768xf32, #tpu.memory_space<vmem>>, vector<16x384xf32>,
    %c0_41 = arith.constant 0 : index
    %c0_42 = arith.constant 0 : index
    %c151 = arith.constant 151 : index
    %61 = vector.load %arg1[%c0_41, %c0_42, %c151] : memref<2x16x640xf32, #tpu.memory_space<vmem>>, vector<1x16x384xf32>
    %62 = vector.shape_cast %61 : vector<1x16x384xf32> to vector<16x384xf32>
    %cst_43 = arith.constant 0.000000e+00 : f32
    %63 = vector.broadcast %cst_43 : f32 to vector<16x384xf32>
    %64 = arith.maximumf %62, %63 : vector<16x384xf32>
    %c96 = arith.constant 96 : index
    %c0_44 = arith.constant 0 : index
    %65 = vector.load %arg7[%c96, %c0_44] : memref<144x768xf32, #tpu.memory_space<vmem>>, vector<16x384xf32>
    tpu.vector_store %arg7[%c96, %c0_44], %64 {strides = array<i32>} : memref<144x768xf32, #tpu.memory_space<vmem>>, vector<16x384xf32>,
    %c0_45 = arith.constant 0 : index
    %c0_46 = arith.constant 0 : index
    %c152 = arith.constant 152 : index
    %66 = vector.load %arg1[%c0_45, %c0_46, %c152] : memref<2x16x640xf32, #tpu.memory_space<vmem>>, vector<1x16x384xf32>
    %67 = vector.shape_cast %66 : vector<1x16x384xf32> to vector<16x384xf32>
    %cst_47 = arith.constant 0.000000e+00 : f32
    %68 = vector.broadcast %cst_47 : f32 to vector<16x384xf32>
    %69 = arith.maximumf %67, %68 : vector<16x384xf32>
    %c112 = arith.constant 112 : index
    %c0_48 = arith.constant 0 : index
    %70 = vector.load %arg7[%c112, %c0_48] : memref<144x768xf32, #tpu.memory_space<vmem>>, vector<16x384xf32>
    tpu.vector_store %arg7[%c112, %c0_48], %69 {strides = array<i32>} : memref<144x768xf32, #tpu.memory_space<vmem>>, vector<16x384xf32>,
    %c0_49 = arith.constant 0 : index
    %c0_50 = arith.constant 0 : index
    %c153 = arith.constant 153 : index
    %71 = vector.load %arg1[%c0_49, %c0_50, %c153] : memref<2x16x640xf32, #tpu.memory_space<vmem>>, vector<1x16x384xf32>
    %72 = vector.shape_cast %71 : vector<1x16x384xf32> to vector<16x384xf32>
    %cst_51 = arith.constant 0.000000e+00 : f32
    %73 = vector.broadcast %cst_51 : f32 to vector<16x384xf32>
    %74 = arith.maximumf %72, %73 : vector<16x384xf32>
    %c128_52 = arith.constant 128 : index
    %c0_53 = arith.constant 0 : index
    %75 = vector.load %arg7[%c128_52, %c0_53] : memref<144x768xf32, #tpu.memory_space<vmem>>, vector<16x384xf32>
    tpu.vector_store %arg7[%c128_52, %c0_53], %74 {strides = array<i32>} : memref<144x768xf32, #tpu.memory_space<vmem>>, vector<16x384xf32>,
    %c1_54 = arith.constant 1 : index
    %c0_55 = arith.constant 0 : index
    %c103_56 = arith.constant 103 : index
    %76 = vector.load %arg1[%c1_54, %c0_55, %c103_56] : memref<2x16x640xf32, #tpu.memory_space<vmem>>, vector<1x16x384xf32>
    %77 = vector.shape_cast %76 : vector<1x16x384xf32> to vector<16x384xf32>
    %cst_57 = arith.constant 0.000000e+00 : f32
    %78 = vector.broadcast %cst_57 : f32 to vector<16x384xf32>
    %79 = arith.maximumf %77, %78 : vector<16x384xf32>
    %c0_58 = arith.constant 0 : index
    %c384 = arith.constant 384 : index
    %80 = vector.load %arg7[%c0_58, %c384] : memref<144x768xf32, #tpu.memory_space<vmem>>, vector<16x384xf32>
    tpu.vector_store %arg7[%c0_58, %c384], %79 {strides = array<i32>} : memref<144x768xf32, #tpu.memory_space<vmem>>, vector<16x384xf32>,
    %c1_59 = arith.constant 1 : index
    %c0_60 = arith.constant 0 : index
    %c104_61 = arith.constant 104 : index
    %81 = vector.load %arg1[%c1_59, %c0_60, %c104_61] : memref<2x16x640xf32, #tpu.memory_space<vmem>>, vector<1x16x384xf32>
    %82 = vector.shape_cast %81 : vector<1x16x384xf32> to vector<16x384xf32>
    %cst_62 = arith.constant 0.000000e+00 : f32
    %83 = vector.broadcast %cst_62 : f32 to vector<16x384xf32>
    %84 = arith.maximumf %82, %83 : vector<16x384xf32>
    %c16_63 = arith.constant 16 : index
    %c384_64 = arith.constant 384 : index
    %85 = vector.load %arg7[%c16_63, %c384_64] : memref<144x768xf32, #tpu.memory_space<vmem>>, vector<16x384xf32>
    tpu.vector_store %arg7[%c16_63, %c384_64], %84 {strides = array<i32>} : memref<144x768xf32, #tpu.memory_space<vmem>>, vector<16x384xf32>,
    %c1_65 = arith.constant 1 : index
    %c0_66 = arith.constant 0 : index
    %c105_67 = arith.constant 105 : index
    %86 = vector.load %arg1[%c1_65, %c0_66, %c105_67] : memref<2x16x640xf32, #tpu.memory_space<vmem>>, vector<1x16x384xf32>
    %87 = vector.shape_cast %86 : vector<1x16x384xf32> to vector<16x384xf32>
    %cst_68 = arith.constant 0.000000e+00 : f32
    %88 = vector.broadcast %cst_68 : f32 to vector<16x384xf32>
    %89 = arith.maximumf %87, %88 : vector<16x384xf32>
    %c32_69 = arith.constant 32 : index
    %c384_70 = arith.constant 384 : index
    %90 = vector.load %arg7[%c32_69, %c384_70] : memref<144x768xf32, #tpu.memory_space<vmem>>, vector<16x384xf32>
    tpu.vector_store %arg7[%c32_69, %c384_70], %89 {strides = array<i32>} : memref<144x768xf32, #tpu.memory_space<vmem>>, vector<16x384xf32>,
    %c1_71 = arith.constant 1 : index
    %c0_72 = arith.constant 0 : index
    %c127_73 = arith.constant 127 : index
    %91 = vector.load %arg1[%c1_71, %c0_72, %c127_73] : memref<2x16x640xf32, #tpu.memory_space<vmem>>, vector<1x16x384xf32>
    %92 = vector.shape_cast %91 : vector<1x16x384xf32> to vector<16x384xf32>
    %cst_74 = arith.constant 0.000000e+00 : f32
    %93 = vector.broadcast %cst_74 : f32 to vector<16x384xf32>
    %94 = arith.maximumf %92, %93 : vector<16x384xf32>
    %c48_75 = arith.constant 48 : index
    %c384_76 = arith.constant 384 : index
    %95 = vector.load %arg7[%c48_75, %c384_76] : memref<144x768xf32, #tpu.memory_space<vmem>>, vector<16x384xf32>
    tpu.vector_store %arg7[%c48_75, %c384_76], %94 {strides = array<i32>} : memref<144x768xf32, #tpu.memory_space<vmem>>, vector<16x384xf32>,
    %c1_77 = arith.constant 1 : index
    %c0_78 = arith.constant 0 : index
    %c128_79 = arith.constant 128 : index
    %96 = vector.load %arg1[%c1_77, %c0_78, %c128_79] : memref<2x16x640xf32, #tpu.memory_space<vmem>>, vector<1x16x384xf32>
    %97 = vector.shape_cast %96 : vector<1x16x384xf32> to vector<16x384xf32>
    %cst_80 = arith.constant 0.000000e+00 : f32
    %98 = vector.broadcast %cst_80 : f32 to vector<16x384xf32>
    %99 = arith.maximumf %97, %98 : vector<16x384xf32>
    %c64_81 = arith.constant 64 : index
    %c384_82 = arith.constant 384 : index
    %100 = vector.load %arg7[%c64_81, %c384_82] : memref<144x768xf32, #tpu.memory_space<vmem>>, vector<16x384xf32>
    tpu.vector_store %arg7[%c64_81, %c384_82], %99 {strides = array<i32>} : memref<144x768xf32, #tpu.memory_space<vmem>>, vector<16x384xf32>,
    %c1_83 = arith.constant 1 : index
    %c0_84 = arith.constant 0 : index
    %c129_85 = arith.constant 129 : index
    %101 = vector.load %arg1[%c1_83, %c0_84, %c129_85] : memref<2x16x640xf32, #tpu.memory_space<vmem>>, vector<1x16x384xf32>
    %102 = vector.shape_cast %101 : vector<1x16x384xf32> to vector<16x384xf32>
    %cst_86 = arith.constant 0.000000e+00 : f32
    %103 = vector.broadcast %cst_86 : f32 to vector<16x384xf32>
    %104 = arith.maximumf %102, %103 : vector<16x384xf32>
    %c80_87 = arith.constant 80 : index
    %c384_88 = arith.constant 384 : index
    %105 = vector.load %arg7[%c80_87, %c384_88] : memref<144x768xf32, #tpu.memory_space<vmem>>, vector<16x384xf32>
    tpu.vector_store %arg7[%c80_87, %c384_88], %104 {strides = array<i32>} : memref<144x768xf32, #tpu.memory_space<vmem>>, vector<16x384xf32>,
    %c1_89 = arith.constant 1 : index
    %c0_90 = arith.constant 0 : index
    %c151_91 = arith.constant 151 : index
    %106 = vector.load %arg1[%c1_89, %c0_90, %c151_91] : memref<2x16x640xf32, #tpu.memory_space<vmem>>, vector<1x16x384xf32>
    %107 = vector.shape_cast %106 : vector<1x16x384xf32> to vector<16x384xf32>
    %cst_92 = arith.constant 0.000000e+00 : f32
    %108 = vector.broadcast %cst_92 : f32 to vector<16x384xf32>
    %109 = arith.maximumf %107, %108 : vector<16x384xf32>
    %c96_93 = arith.constant 96 : index
    %c384_94 = arith.constant 384 : index
    %110 = vector.load %arg7[%c96_93, %c384_94] : memref<144x768xf32, #tpu.memory_space<vmem>>, vector<16x384xf32>
    tpu.vector_store %arg7[%c96_93, %c384_94], %109 {strides = array<i32>} : memref<144x768xf32, #tpu.memory_space<vmem>>, vector<16x384xf32>,
    %c1_95 = arith.constant 1 : index
    %c0_96 = arith.constant 0 : index
    %c152_97 = arith.constant 152 : index
    %111 = vector.load %arg1[%c1_95, %c0_96, %c152_97] : memref<2x16x640xf32, #tpu.memory_space<vmem>>, vector<1x16x384xf32>
    %112 = vector.shape_cast %111 : vector<1x16x384xf32> to vector<16x384xf32>
    %cst_98 = arith.constant 0.000000e+00 : f32
    %113 = vector.broadcast %cst_98 : f32 to vector<16x384xf32>
    %114 = arith.maximumf %112, %113 : vector<16x384xf32>
    %c112_99 = arith.constant 112 : index
    %c384_100 = arith.constant 384 : index
    %115 = vector.load %arg7[%c112_99, %c384_100] : memref<144x768xf32, #tpu.memory_space<vmem>>, vector<16x384xf32>
    tpu.vector_store %arg7[%c112_99, %c384_100], %114 {strides = array<i32>} : memref<144x768xf32, #tpu.memory_space<vmem>>, vector<16x384xf32>,
    %c1_101 = arith.constant 1 : index
    %c0_102 = arith.constant 0 : index
    %c153_103 = arith.constant 153 : index
    %116 = vector.load %arg1[%c1_101, %c0_102, %c153_103] : memref<2x16x640xf32, #tpu.memory_space<vmem>>, vector<1x16x384xf32>
    %117 = vector.shape_cast %116 : vector<1x16x384xf32> to vector<16x384xf32>
    %cst_104 = arith.constant 0.000000e+00 : f32
    %118 = vector.broadcast %cst_104 : f32 to vector<16x384xf32>
    %119 = arith.maximumf %117, %118 : vector<16x384xf32>
    %c128_105 = arith.constant 128 : index
    %c384_106 = arith.constant 384 : index
    %120 = vector.load %arg7[%c128_105, %c384_106] : memref<144x768xf32, #tpu.memory_space<vmem>>, vector<16x384xf32>
    tpu.vector_store %arg7[%c128_105, %c384_106], %119 {strides = array<i32>} : memref<144x768xf32, #tpu.memory_space<vmem>>, vector<16x384xf32>,
    %c0_107 = arith.constant 0 : index
    %c0_108 = arith.constant 0 : index
    %121 = vector.load %arg2[%c0_107, %c0_108] : memref<16x144xf32, #tpu.memory_space<vmem>>, vector<16x144xf32>
    %c0_109 = arith.constant 0 : index
    %c0_110 = arith.constant 0 : index
    %122 = vector.load %arg7[%c0_109, %c0_110] : memref<144x768xf32, #tpu.memory_space<vmem>>, vector<144x768xf32>
    %cst_111 = arith.constant dense<0.000000e+00> : vector<16x768xf32>
    %123 = tpu.matmul %121, %122, %cst_111 {dimension_numbers = #tpu.dot_dimension_numbers<[1], [0], [0], [1], [0, 0, 1, 1], [], []>} : vector<16x144xf32>, vector<144x768xf32>, vector<16x768xf32> -> vector<16x768xf32>
    %c0_112 = arith.constant 0 : index
    %c0_113 = arith.constant 0 : index
    %124 = vector.load %arg3[%c0_112, %c0_113] : memref<16x1xf32, #tpu.memory_space<vmem>>, vector<16x1xf32>
    %125 = vector.broadcast %124 : vector<16x1xf32> to vector<16x768xf32>
    %126 = arith.addf %123, %125 : vector<16x768xf32>
    %cst_114 = arith.constant 0.000000e+00 : f32
    %127 = vector.broadcast %cst_114 : f32 to vector<16x768xf32>
    %128 = arith.maximumf %126, %127 : vector<16x768xf32>
    %129 = vector.broadcast %14 : vector<1x768xf32> to vector<16x768xf32>
    %130 = arith.mulf %128, %129 : vector<16x768xf32>
    %131 = vector.extract_strided_slice %130 {offsets = [0, 0], sizes = [16, 384], strides = [1, 1]} : vector<16x768xf32> to vector<16x384xf32>
    %c0_115 = arith.constant 0 : index
    %c0_116 = arith.constant 0 : index
    %c128_117 = arith.constant 128 : index
    %132 = vector.load %arg8[%c0_115, %c0_116, %c128_117] : memref<2x16x640xf32, #tpu.memory_space<vmem>>, vector<1x16x384xf32>
    %133 = vector.shape_cast %132 : vector<1x16x384xf32> to vector<16x384xf32>
    %134 = vector.shape_cast %131 : vector<16x384xf32> to vector<1x16x384xf32>
    tpu.vector_store %arg8[%c0_115, %c0_116, %c128_117], %134 {strides = array<i32>} : memref<2x16x640xf32, #tpu.memory_space<vmem>>, vector<1x16x384xf32>,
    %135 = vector.extract_strided_slice %130 {offsets = [0, 384], sizes = [16, 384], strides = [1, 1]} : vector<16x768xf32> to vector<16x384xf32>
    %c1_118 = arith.constant 1 : index
    %c0_119 = arith.constant 0 : index
    %c128_120 = arith.constant 128 : index
    %136 = vector.load %arg8[%c1_118, %c0_119, %c128_120] : memref<2x16x640xf32, #tpu.memory_space<vmem>>, vector<1x16x384xf32>
    %137 = vector.shape_cast %136 : vector<1x16x384xf32> to vector<16x384xf32>
    %138 = vector.shape_cast %135 : vector<16x384xf32> to vector<1x16x384xf32>
    tpu.vector_store %arg8[%c1_118, %c0_119, %c128_120], %138 {strides = array<i32>} : memref<2x16x640xf32, #tpu.memory_space<vmem>>, vector<1x16x384xf32>,
    %c0_121 = arith.constant 0 : index
    %c0_122 = arith.constant 0 : index
    %c103_123 = arith.constant 103 : index
    %139 = vector.load %arg8[%c0_121, %c0_122, %c103_123] : memref<2x16x640xf32, #tpu.memory_space<vmem>>, vector<1x16x384xf32>
    %140 = vector.shape_cast %139 : vector<1x16x384xf32> to vector<16x384xf32>
    %c0_124 = arith.constant 0 : index
    %c0_125 = arith.constant 0 : index
    %141 = vector.load %arg7[%c0_124, %c0_125] : memref<144x768xf32, #tpu.memory_space<vmem>>, vector<16x384xf32>
    tpu.vector_store %arg7[%c0_124, %c0_125], %140 {strides = array<i32>} : memref<144x768xf32, #tpu.memory_space<vmem>>, vector<16x384xf32>,
    %c0_126 = arith.constant 0 : index
    %c0_127 = arith.constant 0 : index
    %c104_128 = arith.constant 104 : index
    %142 = vector.load %arg8[%c0_126, %c0_127, %c104_128] : memref<2x16x640xf32, #tpu.memory_space<vmem>>, vector<1x16x384xf32>
    %143 = vector.shape_cast %142 : vector<1x16x384xf32> to vector<16x384xf32>
    %c16_129 = arith.constant 16 : index
    %c0_130 = arith.constant 0 : index
    %144 = vector.load %arg7[%c16_129, %c0_130] : memref<144x768xf32, #tpu.memory_space<vmem>>, vector<16x384xf32>
    tpu.vector_store %arg7[%c16_129, %c0_130], %143 {strides = array<i32>} : memref<144x768xf32, #tpu.memory_space<vmem>>, vector<16x384xf32>,
    %c0_131 = arith.constant 0 : index
    %c0_132 = arith.constant 0 : index
    %c105_133 = arith.constant 105 : index
    %145 = vector.load %arg8[%c0_131, %c0_132, %c105_133] : memref<2x16x640xf32, #tpu.memory_space<vmem>>, vector<1x16x384xf32>
    %146 = vector.shape_cast %145 : vector<1x16x384xf32> to vector<16x384xf32>
    %c32_134 = arith.constant 32 : index
    %c0_135 = arith.constant 0 : index
    %147 = vector.load %arg7[%c32_134, %c0_135] : memref<144x768xf32, #tpu.memory_space<vmem>>, vector<16x384xf32>
    tpu.vector_store %arg7[%c32_134, %c0_135], %146 {strides = array<i32>} : memref<144x768xf32, #tpu.memory_space<vmem>>, vector<16x384xf32>,
    %c0_136 = arith.constant 0 : index
    %c0_137 = arith.constant 0 : index
    %c127_138 = arith.constant 127 : index
    %148 = vector.load %arg8[%c0_136, %c0_137, %c127_138] : memref<2x16x640xf32, #tpu.memory_space<vmem>>, vector<1x16x384xf32>
    %149 = vector.shape_cast %148 : vector<1x16x384xf32> to vector<16x384xf32>
    %c48_139 = arith.constant 48 : index
    %c0_140 = arith.constant 0 : index
    %150 = vector.load %arg7[%c48_139, %c0_140] : memref<144x768xf32, #tpu.memory_space<vmem>>, vector<16x384xf32>
    tpu.vector_store %arg7[%c48_139, %c0_140], %149 {strides = array<i32>} : memref<144x768xf32, #tpu.memory_space<vmem>>, vector<16x384xf32>,
    %c0_141 = arith.constant 0 : index
    %c0_142 = arith.constant 0 : index
    %c128_143 = arith.constant 128 : index
    %151 = vector.load %arg8[%c0_141, %c0_142, %c128_143] : memref<2x16x640xf32, #tpu.memory_space<vmem>>, vector<1x16x384xf32>
    %152 = vector.shape_cast %151 : vector<1x16x384xf32> to vector<16x384xf32>
    %c64_144 = arith.constant 64 : index
    %c0_145 = arith.constant 0 : index
    %153 = vector.load %arg7[%c64_144, %c0_145] : memref<144x768xf32, #tpu.memory_space<vmem>>, vector<16x384xf32>
    tpu.vector_store %arg7[%c64_144, %c0_145], %152 {strides = array<i32>} : memref<144x768xf32, #tpu.memory_space<vmem>>, vector<16x384xf32>,
    %c0_146 = arith.constant 0 : index
    %c0_147 = arith.constant 0 : index
    %c129_148 = arith.constant 129 : index
    %154 = vector.load %arg8[%c0_146, %c0_147, %c129_148] : memref<2x16x640xf32, #tpu.memory_space<vmem>>, vector<1x16x384xf32>
    %155 = vector.shape_cast %154 : vector<1x16x384xf32> to vector<16x384xf32>
    %c80_149 = arith.constant 80 : index
    %c0_150 = arith.constant 0 : index
    %156 = vector.load %arg7[%c80_149, %c0_150] : memref<144x768xf32, #tpu.memory_space<vmem>>, vector<16x384xf32>
    tpu.vector_store %arg7[%c80_149, %c0_150], %155 {strides = array<i32>} : memref<144x768xf32, #tpu.memory_space<vmem>>, vector<16x384xf32>,
    %c0_151 = arith.constant 0 : index
    %c0_152 = arith.constant 0 : index
    %c151_153 = arith.constant 151 : index
    %157 = vector.load %arg8[%c0_151, %c0_152, %c151_153] : memref<2x16x640xf32, #tpu.memory_space<vmem>>, vector<1x16x384xf32>
    %158 = vector.shape_cast %157 : vector<1x16x384xf32> to vector<16x384xf32>
    %c96_154 = arith.constant 96 : index
    %c0_155 = arith.constant 0 : index
    %159 = vector.load %arg7[%c96_154, %c0_155] : memref<144x768xf32, #tpu.memory_space<vmem>>, vector<16x384xf32>
    tpu.vector_store %arg7[%c96_154, %c0_155], %158 {strides = array<i32>} : memref<144x768xf32, #tpu.memory_space<vmem>>, vector<16x384xf32>,
    %c0_156 = arith.constant 0 : index
    %c0_157 = arith.constant 0 : index
    %c152_158 = arith.constant 152 : index
    %160 = vector.load %arg8[%c0_156, %c0_157, %c152_158] : memref<2x16x640xf32, #tpu.memory_space<vmem>>, vector<1x16x384xf32>
    %161 = vector.shape_cast %160 : vector<1x16x384xf32> to vector<16x384xf32>
    %c112_159 = arith.constant 112 : index
    %c0_160 = arith.constant 0 : index
    %162 = vector.load %arg7[%c112_159, %c0_160] : memref<144x768xf32, #tpu.memory_space<vmem>>, vector<16x384xf32>
    tpu.vector_store %arg7[%c112_159, %c0_160], %161 {strides = array<i32>} : memref<144x768xf32, #tpu.memory_space<vmem>>, vector<16x384xf32>,
    %c0_161 = arith.constant 0 : index
    %c0_162 = arith.constant 0 : index
    %c153_163 = arith.constant 153 : index
    %163 = vector.load %arg8[%c0_161, %c0_162, %c153_163] : memref<2x16x640xf32, #tpu.memory_space<vmem>>, vector<1x16x384xf32>
    %164 = vector.shape_cast %163 : vector<1x16x384xf32> to vector<16x384xf32>
    %c128_164 = arith.constant 128 : index
    %c0_165 = arith.constant 0 : index
    %165 = vector.load %arg7[%c128_164, %c0_165] : memref<144x768xf32, #tpu.memory_space<vmem>>, vector<16x384xf32>
    tpu.vector_store %arg7[%c128_164, %c0_165], %164 {strides = array<i32>} : memref<144x768xf32, #tpu.memory_space<vmem>>, vector<16x384xf32>,
    %c1_166 = arith.constant 1 : index
    %c0_167 = arith.constant 0 : index
    %c103_168 = arith.constant 103 : index
    %166 = vector.load %arg8[%c1_166, %c0_167, %c103_168] : memref<2x16x640xf32, #tpu.memory_space<vmem>>, vector<1x16x384xf32>
    %167 = vector.shape_cast %166 : vector<1x16x384xf32> to vector<16x384xf32>
    %c0_169 = arith.constant 0 : index
    %c384_170 = arith.constant 384 : index
    %168 = vector.load %arg7[%c0_169, %c384_170] : memref<144x768xf32, #tpu.memory_space<vmem>>, vector<16x384xf32>
    tpu.vector_store %arg7[%c0_169, %c384_170], %167 {strides = array<i32>} : memref<144x768xf32, #tpu.memory_space<vmem>>, vector<16x384xf32>,
    %c1_171 = arith.constant 1 : index
    %c0_172 = arith.constant 0 : index
    %c104_173 = arith.constant 104 : index
    %169 = vector.load %arg8[%c1_171, %c0_172, %c104_173] : memref<2x16x640xf32, #tpu.memory_space<vmem>>, vector<1x16x384xf32>
    %170 = vector.shape_cast %169 : vector<1x16x384xf32> to vector<16x384xf32>
    %c16_174 = arith.constant 16 : index
    %c384_175 = arith.constant 384 : index
    %171 = vector.load %arg7[%c16_174, %c384_175] : memref<144x768xf32, #tpu.memory_space<vmem>>, vector<16x384xf32>
    tpu.vector_store %arg7[%c16_174, %c384_175], %170 {strides = array<i32>} : memref<144x768xf32, #tpu.memory_space<vmem>>, vector<16x384xf32>,
    %c1_176 = arith.constant 1 : index
    %c0_177 = arith.constant 0 : index
    %c105_178 = arith.constant 105 : index
    %172 = vector.load %arg8[%c1_176, %c0_177, %c105_178] : memref<2x16x640xf32, #tpu.memory_space<vmem>>, vector<1x16x384xf32>
    %173 = vector.shape_cast %172 : vector<1x16x384xf32> to vector<16x384xf32>
    %c32_179 = arith.constant 32 : index
    %c384_180 = arith.constant 384 : index
    %174 = vector.load %arg7[%c32_179, %c384_180] : memref<144x768xf32, #tpu.memory_space<vmem>>, vector<16x384xf32>
    tpu.vector_store %arg7[%c32_179, %c384_180], %173 {strides = array<i32>} : memref<144x768xf32, #tpu.memory_space<vmem>>, vector<16x384xf32>,
    %c1_181 = arith.constant 1 : index
    %c0_182 = arith.constant 0 : index
    %c127_183 = arith.constant 127 : index
    %175 = vector.load %arg8[%c1_181, %c0_182, %c127_183] : memref<2x16x640xf32, #tpu.memory_space<vmem>>, vector<1x16x384xf32>
    %176 = vector.shape_cast %175 : vector<1x16x384xf32> to vector<16x384xf32>
    %c48_184 = arith.constant 48 : index
    %c384_185 = arith.constant 384 : index
    %177 = vector.load %arg7[%c48_184, %c384_185] : memref<144x768xf32, #tpu.memory_space<vmem>>, vector<16x384xf32>
    tpu.vector_store %arg7[%c48_184, %c384_185], %176 {strides = array<i32>} : memref<144x768xf32, #tpu.memory_space<vmem>>, vector<16x384xf32>,
    %c1_186 = arith.constant 1 : index
    %c0_187 = arith.constant 0 : index
    %c128_188 = arith.constant 128 : index
    %178 = vector.load %arg8[%c1_186, %c0_187, %c128_188] : memref<2x16x640xf32, #tpu.memory_space<vmem>>, vector<1x16x384xf32>
    %179 = vector.shape_cast %178 : vector<1x16x384xf32> to vector<16x384xf32>
    %c64_189 = arith.constant 64 : index
    %c384_190 = arith.constant 384 : index
    %180 = vector.load %arg7[%c64_189, %c384_190] : memref<144x768xf32, #tpu.memory_space<vmem>>, vector<16x384xf32>
    tpu.vector_store %arg7[%c64_189, %c384_190], %179 {strides = array<i32>} : memref<144x768xf32, #tpu.memory_space<vmem>>, vector<16x384xf32>,
    %c1_191 = arith.constant 1 : index
    %c0_192 = arith.constant 0 : index
    %c129_193 = arith.constant 129 : index
    %181 = vector.load %arg8[%c1_191, %c0_192, %c129_193] : memref<2x16x640xf32, #tpu.memory_space<vmem>>, vector<1x16x384xf32>
    %182 = vector.shape_cast %181 : vector<1x16x384xf32> to vector<16x384xf32>
    %c80_194 = arith.constant 80 : index
    %c384_195 = arith.constant 384 : index
    %183 = vector.load %arg7[%c80_194, %c384_195] : memref<144x768xf32, #tpu.memory_space<vmem>>, vector<16x384xf32>
    tpu.vector_store %arg7[%c80_194, %c384_195], %182 {strides = array<i32>} : memref<144x768xf32, #tpu.memory_space<vmem>>, vector<16x384xf32>,
    %c1_196 = arith.constant 1 : index
    %c0_197 = arith.constant 0 : index
    %c151_198 = arith.constant 151 : index
    %184 = vector.load %arg8[%c1_196, %c0_197, %c151_198] : memref<2x16x640xf32, #tpu.memory_space<vmem>>, vector<1x16x384xf32>
    %185 = vector.shape_cast %184 : vector<1x16x384xf32> to vector<16x384xf32>
    %c96_199 = arith.constant 96 : index
    %c384_200 = arith.constant 384 : index
    %186 = vector.load %arg7[%c96_199, %c384_200] : memref<144x768xf32, #tpu.memory_space<vmem>>, vector<16x384xf32>
    tpu.vector_store %arg7[%c96_199, %c384_200], %185 {strides = array<i32>} : memref<144x768xf32, #tpu.memory_space<vmem>>, vector<16x384xf32>,
    %c1_201 = arith.constant 1 : index
    %c0_202 = arith.constant 0 : index
    %c152_203 = arith.constant 152 : index
    %187 = vector.load %arg8[%c1_201, %c0_202, %c152_203] : memref<2x16x640xf32, #tpu.memory_space<vmem>>, vector<1x16x384xf32>
    %188 = vector.shape_cast %187 : vector<1x16x384xf32> to vector<16x384xf32>
    %c112_204 = arith.constant 112 : index
    %c384_205 = arith.constant 384 : index
    %189 = vector.load %arg7[%c112_204, %c384_205] : memref<144x768xf32, #tpu.memory_space<vmem>>, vector<16x384xf32>
    tpu.vector_store %arg7[%c112_204, %c384_205], %188 {strides = array<i32>} : memref<144x768xf32, #tpu.memory_space<vmem>>, vector<16x384xf32>,
    %c1_206 = arith.constant 1 : index
    %c0_207 = arith.constant 0 : index
    %c153_208 = arith.constant 153 : index
    %190 = vector.load %arg8[%c1_206, %c0_207, %c153_208] : memref<2x16x640xf32, #tpu.memory_space<vmem>>, vector<1x16x384xf32>
    %191 = vector.shape_cast %190 : vector<1x16x384xf32> to vector<16x384xf32>
    %c128_209 = arith.constant 128 : index
    %c384_210 = arith.constant 384 : index
    %192 = vector.load %arg7[%c128_209, %c384_210] : memref<144x768xf32, #tpu.memory_space<vmem>>, vector<16x384xf32>
    tpu.vector_store %arg7[%c128_209, %c384_210], %191 {strides = array<i32>} : memref<144x768xf32, #tpu.memory_space<vmem>>, vector<16x384xf32>,
    %c0_211 = arith.constant 0 : index
    %c0_212 = arith.constant 0 : index
    %193 = vector.load %arg4[%c0_211, %c0_212] : memref<16x144xf32, #tpu.memory_space<vmem>>, vector<16x144xf32>
    %c0_213 = arith.constant 0 : index
    %c0_214 = arith.constant 0 : index
    %194 = vector.load %arg7[%c0_213, %c0_214] : memref<144x768xf32, #tpu.memory_space<vmem>>, vector<144x768xf32>
    %cst_215 = arith.constant dense<0.000000e+00> : vector<16x768xf32>
    %195 = tpu.matmul %193, %194, %cst_215 {dimension_numbers = #tpu.dot_dimension_numbers<[1], [0], [0], [1], [0, 0, 1, 1], [], []>} : vector<16x144xf32>, vector<144x768xf32>, vector<16x768xf32> -> vector<16x768xf32>
    %c0_216 = arith.constant 0 : index
    %c0_217 = arith.constant 0 : index
    %196 = vector.load %arg5[%c0_216, %c0_217] : memref<16x1xf32, #tpu.memory_space<vmem>>, vector<16x1xf32>
    %197 = vector.broadcast %196 : vector<16x1xf32> to vector<16x768xf32>
    %198 = arith.addf %195, %197 : vector<16x768xf32>
    %199 = vector.extract_strided_slice %198 {offsets = [0, 0], sizes = [16, 384], strides = [1, 1]} : vector<16x768xf32> to vector<16x384xf32>
    %c0_218 = arith.constant 0 : index
    %c0_219 = arith.constant 0 : index
    %c128_220 = arith.constant 128 : index
    %200 = vector.load %arg1[%c0_218, %c0_219, %c128_220] : memref<2x16x640xf32, #tpu.memory_space<vmem>>, vector<1x16x384xf32>
    %201 = vector.shape_cast %200 : vector<1x16x384xf32> to vector<16x384xf32>
    %202 = arith.addf %199, %201 : vector<16x384xf32>
    %c0_221 = arith.constant 0 : index
    %c0_222 = arith.constant 0 : index
    %c0_223 = arith.constant 0 : index
    %203 = vector.load %arg6[%c0_221, %c0_222, %c0_223] : memref<2x16x384xf32, #tpu.memory_space<vmem>>, vector<1x16x384xf32>
    %204 = vector.shape_cast %203 : vector<1x16x384xf32> to vector<16x384xf32>
    %205 = vector.shape_cast %202 : vector<16x384xf32> to vector<1x16x384xf32>
    tpu.vector_store %arg6[%c0_221, %c0_222, %c0_223], %205 {strides = array<i32>} : memref<2x16x384xf32, #tpu.memory_space<vmem>>, vector<1x16x384xf32>,
    %206 = vector.extract_strided_slice %198 {offsets = [0, 384], sizes = [16, 384], strides = [1, 1]} : vector<16x768xf32> to vector<16x384xf32>
    %c1_224 = arith.constant 1 : index
    %c0_225 = arith.constant 0 : index
    %c128_226 = arith.constant 128 : index
    %207 = vector.load %arg1[%c1_224, %c0_225, %c128_226] : memref<2x16x640xf32, #tpu.memory_space<vmem>>, vector<1x16x384xf32>
    %208 = vector.shape_cast %207 : vector<1x16x384xf32> to vector<16x384xf32>
    %209 = arith.addf %206, %208 : vector<16x384xf32>
    %c1_227 = arith.constant 1 : index
    %c0_228 = arith.constant 0 : index
    %c0_229 = arith.constant 0 : index
    %210 = vector.load %arg6[%c1_227, %c0_228, %c0_229] : memref<2x16x384xf32, #tpu.memory_space<vmem>>, vector<1x16x384xf32>
    %211 = vector.shape_cast %210 : vector<1x16x384xf32> to vector<16x384xf32>
    %212 = vector.shape_cast %209 : vector<16x384xf32> to vector<1x16x384xf32>
    tpu.vector_store %arg6[%c1_227, %c0_228, %c0_229], %212 {strides = array<i32>} : memref<2x16x384xf32, #tpu.memory_space<vmem>>, vector<1x16x384xf32>,
    return
  }
  func.func @transform_0(%arg0: i32) -> (i32, i32, i32) {
    %c0_i32 = arith.constant 0 : i32
    %c0_i32_0 = arith.constant 0 : i32
    %c0_i32_1 = arith.constant 0 : i32
    %c0_i32_2 = arith.constant 0 : i32
    return %c0_i32, %c0_i32_0, %c0_i32_1 : i32, i32, i32
  }
  func.func @transform_1(%arg0: i32) -> (i32, i32) {
    %c0_i32 = arith.constant 0 : i32
    %c0_i32_0 = arith.constant 0 : i32
    %c0_i32_1 = arith.constant 0 : i32
    return %c0_i32, %c0_i32_0 : i32, i32
  }
  func.func @transform_2(%arg0: i32) -> (i32, i32) {
    %c0_i32 = arith.constant 0 : i32
    %c0_i32_0 = arith.constant 0 : i32
    %c0_i32_1 = arith.constant 0 : i32
    return %c0_i32, %c0_i32_0 : i32, i32
  }
  func.func @transform_3(%arg0: i32) -> (i32, i32) {
    %c0_i32 = arith.constant 0 : i32
    %c0_i32_0 = arith.constant 0 : i32
    %c0_i32_1 = arith.constant 0 : i32
    return %c0_i32, %c0_i32_0 : i32, i32
  }
  func.func @transform_4(%arg0: i32) -> (i32, i32) {
    %c0_i32 = arith.constant 0 : i32
    %c0_i32_0 = arith.constant 0 : i32
    %c0_i32_1 = arith.constant 0 : i32
    return %c0_i32, %c0_i32_0 : i32, i32
  }
  func.func @transform_5(%arg0: i32) -> (i32, i32, i32) {
    %c0_i32 = arith.constant 0 : i32
    %c0_i32_0 = arith.constant 0 : i32
    %c0_i32_1 = arith.constant 0 : i32
    %c0_i32_2 = arith.constant 0 : i32
    return %c0_i32, %c0_i32_0, %c0_i32_1 : i32, i32, i32
  }
}

</mosaic_0001>

<bundles_post_ra>
// kernel: residual_block.1
= control target key start
LH: loop header
LB: loop body
LE: loop exit
PB: predicated region body
PF: predicated region fallthrough
CT: control target
= control target key end

     0   :  { %s3661_s30 = smov 25   ;;  %s3662_s6 = smov 24   ;;  %vm1193_vm0 = vcmask 130048   ;;  %vm136_vm1 = vcmask 203776   ;;  %vm195_vm2 = vcmask 195584   ;;  %vm254_vm3 = vcmask 187392   ;;  %s5004_s0 = inlined_call_operand.vmem [shape: f32[2,16,640], index: 0, kind: input, shape index: {}]   ;;  %s5005_s1 = inlined_call_operand.vmem [shape: f32[16,144], index: 1, kind: input, shape index: {}]   ;;  %s5006_s2 = inlined_call_operand.vmem [shape: f32[16,1], index: 2, kind: input, shape index: {}]   ;;  %s5007_s3 = inlined_call_operand.vmem [shape: f32[16,144], index: 3, kind: input, shape index: {}]   ;;  %s5008_s4 = inlined_call_operand.vmem [shape: f32[16,1], index: 4, kind: input, shape index: {}]   ;;  %s5009_s5 = inlined_call_operand.vmem [shape: f32[2,16,384], index: 5, kind: output, shape index: {}]  }
   0x1   :  { %v97_v0 = vld [vmem:[%s5004_s0 + $0x8] sm:$0xff]  ;;  %v98_v1 = vld [vmem:[%s5004_s0 + $0x10] sm:$0xff]  ;;  %v96_v2 = vld [vmem:[%s5004_s0] sm:$0xff]  ;;  %s3663_s7 = smov 23   ;;  %s3664_s12 = smov 1   ;;  %vm313_vm4 = vcmask 7168  }
   0x2   :  { %v3710_v3 = vmax.f32 %v97_v0, 0.0  ;;  %v3712_v4 = vmax.f32 %v98_v1, 0.0  ;;  %v100_v5 = vld [vmem:[%s5004_s0 + $0x28] sm:$0xff]  ;;  %v104_v6 = vmax.f32 %v96_v2, 0.0  ;;  %v101_v7 = vld [vmem:[%s5004_s0 + $0x30] sm:$0xff]  ;;  %v102_v8 = vld [vmem:[%s5004_s0 + $0x38] sm:$0xff] }
   0x3   :  { %v108_v9 = vmax.f32 %v100_v5, 0.0  ;;  %v3723_v10 = vmax.f32 %v101_v7, 0.0  ;;  %v3725_v11 = vmax.f32 %v102_v8, 0.0  ;;  %v352_v15 = vld [vmem:[%s5004_s0 + $0x18] sm:$0xff]  ;;  %v356_v16 = vld [vmem:[%s5004_s0 + $0x40] sm:$0xff]  ;;  %v2699_v21 = vld [vmem:[%s5004_s0 + $0x50] sm:$0xff] }
   0x4   :  { %v3019_v12 = vpack.i.bf16 %v3712_v4, %v3710_v3  ;;  %v360_v18 = vmax.f32 %v352_v15, 0.0  ;;  %v364_v20 = vmax.f32 %v356_v16, 0.0  ;;  %v3757_v22 = vld [vmem:[%s5004_s0 + $0x58] sm:$0xff]  ;;  %v595_v25 = vmax.f32 %v2699_v21, 0.0  ;;  %v2704_v28 = vld [vmem:[%s5004_s0 + $0x80] sm:$0xff]  ;;  %s3665_s21 = smov 127  }
   0x5   :  { %v3029_v13 = vpack.i.bf16 %v108_v9, %v104_v6  ;;  %v3024_v14 = vpack.i.bf16 %v3725_v11, %v3723_v10  ;;  %v2809_v17 = vpack.c.bf16 %v3725_v11, %v3712_v4  ;;  %v2811_v19 = vpack.c.bf16 %v3723_v10, %v3710_v3  ;;  %v2703_v27 = vld [vmem:[%s5004_s0 + $0x78] sm:$0xff]  ;;  %s3666_s22 = smov 105   ;;  %s3667_s23 = smov 104   ;;  %v2701_v35 = vld [vmem:[%s5004_s0 + $0x60] sm:$0xff]  ;;  %v2702_v36 = vld [vmem:[%s5004_s0 + $0x68] sm:$0xff] }
   0x6   :  { %3020 = vrot.lane.b32.xlu0 %v3019_v12, %s3661_s30  ;;  %v3079_v23 = vpack.i.bf16 %v360_v18, %v3712_v4  ;;  %v3084_v24 = vpack.i.bf16 %v364_v20, %v3725_v11  ;;  %v596_v26 = vmax.f32 %v3757_v22, 0.0  ;;  %v3089_v29 = vpack.i.bf16 %v3723_v10, %v3710_v3  ;;  %s3668_s24 = smov 103   ;;  %v2705_v37 = vld [vmem:[%s5004_s0 + $0x88] sm:$0xff]  ;;  %v2706_v38 = vld [vmem:[%s5004_s0 + $0x90] sm:$0xff]  ;;  %v353_v46 = vld [vmem:[%s5004_s0 + $0x20] sm:$0xff] }
   0x7   :  { %3030 = vrot.lane.b32.xlu1 %v3029_v13, %s3661_s30  ;;  %v599_v30 = vmax.f32 %v2703_v27, 0.0  ;;  %v600_v31 = vmax.f32 %v2704_v28, 0.0  ;;  %v3104_v34 = vpack.i.bf16 %v364_v20, %v360_v18  ;;  %v597_v39 = vmax.f32 %v2701_v35, 0.0  ;;  %v3808_v41 = vld [vmem:[%s5005_s1 + $0x8] sm:$0xff]  ;;  %v2740_v53 = vld [vmem:[%s5004_s0 + $0x70] sm:$0xff]  ;;  %v2744_v54 = vld [vmem:[%s5004_s0 + $0x98] sm:$0xff] }
   0x8   :  { %v3094_v32 = vpack.i.bf16 %v596_v26, %v595_v25  ;;  %v598_v40 = vmax.f32 %v2702_v36, 0.0  ;;  %v601_v42 = vmax.f32 %v2705_v37, 0.0  ;;  %v602_v43 = vmax.f32 %v2706_v38, 0.0  ;;  %2769 = vmatprep.mubr.msk.f32.mxu0 %vm1193_vm0, %v3808_v41  ;;  %2771 = vmatprep.mubr.msk.f32.mxu1 %vm1193_vm0, %v3808_v41  ;;  %v357_v47 = vld [vmem:[%s5004_s0 + $0x48] sm:$0xff] }
   0x9   :  { %v3099_v33 = vpack.i.bf16 %v600_v31, %v599_v30  ;;  %v3219_v48 = vpack.i.bf16 %v597_v39, %v596_v26  ;;  %v361_v49 = vmax.f32 %v353_v46, 0.0  ;;  %v365_v50 = vmax.f32 %v357_v47, 0.0 }
   0xa   :  { %3025 = vrot.lane.b32.xlu0 %v3024_v14, %s3661_s30  ;;  %v3199_v44 = vpack.i.bf16 %v598_v40, %v597_v39  ;;  %v3204_v45 = vpack.i.bf16 %v602_v43, %v601_v42  ;;  %v3224_v51 = vpack.i.bf16 %v601_v42, %v600_v31  ;;  %v848_v55 = vmax.f32 %v2740_v53, 0.0 }
   0xb   :  { %3035 = vrot.lane.b32.xlu1 %v3019_v12, %s3662_s6  ;;  %v3229_v52 = vpack.i.bf16 %v365_v50, %v361_v49  ;;  %v852_v56 = vmax.f32 %v2744_v54, 0.0  ;;  %v3669_v31 = vmov 0   ;;  %vm390_vm5 = vcmask 1039360  }
   0xc   :  { %v3299_v57 = vpack.i.bf16 %v848_v55, %v598_v40  ;;  %3339 = vset.pattern.permute.xlu0 %v3669_v31  ;;  %3340 = vset.pattern.permute.xlu1 %v3669_v31  ;;  %vm449_vm6 = vcmask 859136   ;;  %vm508_vm7 = vcmask 850944   ;;  %vm567_vm8 = vcmask 842752  }
   0xd   :  { %v3304_v58 = vpack.i.bf16 %v852_v56, %v602_v43 }
   0xe   :  { %3040 = vrot.lane.b32.xlu0 %v3024_v14, %s3662_s6 }
   0xf   :  { %3045 = vrot.lane.b32.xlu1 %v3029_v13, %s3662_s6 }
  0x12   :  { %3050 = vrot.lane.b32.xlu0 %v3019_v12, %s3663_s7 }
  0x13   :  { %3055 = vrot.lane.b32.xlu1 %v3024_v14, %s3663_s7 }
  0x16   :  { %3060 = vrot.lane.b32.xlu0 %v3029_v13, %s3663_s7 }
  0x17   :  { %3065 = vrot.lane.b32.xlu1 %v3019_v12, %s3664_s12 }
  0x1a   :  { %3070 = vrot.lane.b32.xlu0 %v3024_v14, %s3664_s12 }
  0x1b   :  { %3075 = vrot.lane.b32.xlu1 %v3029_v13, %s3664_s12 }
  0x1e   :  { %3080 = vrot.lane.b32.xlu0 %v3079_v23, %s3665_s21 }
  0x1f   :  { %3085 = vrot.lane.b32.xlu1 %v3084_v24, %s3665_s21 }
  0x22   :  { %3090 = vrot.lane.b32.xlu0 %v3089_v29, %s3665_s21 }
  0x23   :  { %3095 = vrot.lane.b32.xlu1 %v3094_v32, %s3661_s30 }
  0x26   :  { %3100 = vrot.lane.b32.xlu0 %v3099_v33, %s3661_s30 }
  0x27   :  { %3105 = vrot.lane.b32.xlu1 %v3104_v34, %s3661_s30 }
  0x2a   :  { %3110 = vrot.lane.b32.xlu0 %v3079_v23, %s3666_s22 }
  0x2b   :  { %3115 = vrot.lane.b32.xlu1 %v3084_v24, %s3666_s22 }
  0x2e   :  { %3120 = vrot.lane.b32.xlu0 %v3089_v29, %s3666_s22 }
  0x2f   :  { %3125 = vrot.lane.b32.xlu1 %v3094_v32, %s3662_s6 }
  0x32   :  { %3130 = vrot.lane.b32.xlu0 %v3099_v33, %s3662_s6 }
  0x33   :  { %3135 = vrot.lane.b32.xlu1 %v3104_v34, %s3662_s6 }
  0x36   :  { %3140 = vrot.lane.b32.xlu0 %v3079_v23, %s3667_s23 }
  0x37   :  { %3145 = vrot.lane.b32.xlu1 %v3084_v24, %s3667_s23 }
  0x3a   :  { %3150 = vrot.lane.b32.xlu0 %v3089_v29, %s3667_s23 }
  0x3b   :  { %3155 = vrot.lane.b32.xlu1 %v3094_v32, %s3663_s7 }
  0x3e   :  { %3160 = vrot.lane.b32.xlu0 %v3099_v33, %s3663_s7 }
  0x3f   :  { %3165 = vrot.lane.b32.xlu1 %v3104_v34, %s3663_s7 }
  0x42   :  { %3170 = vrot.lane.b32.xlu0 %v3079_v23, %s3668_s24 }
  0x43   :  { %3175 = vrot.lane.b32.xlu1 %v3084_v24, %s3668_s24 }
  0x46   :  { %3180 = vrot.lane.b32.xlu0 %v3089_v29, %s3668_s24 }
  0x47   :  { %3185 = vrot.lane.b32.xlu1 %v3094_v32, %s3664_s12  ;;  %v1181_v32 = vld [vmem:[%s5006_s2] sm:$0xff] }
  0x4a   :  { %3190 = vrot.lane.b32.xlu0 %v3099_v33, %s3664_s12  ;;  %v1182_v33 = vld [vmem:[%s5006_s2 + $0x8] sm:$0xff] }
  0x4b   :  { %3195 = vrot.lane.b32.xlu1 %v3104_v34, %s3664_s12 }
  0x4e   :  { %3200 = vrot.lane.b32.xlu0 %v3199_v44, %s3661_s30 }
  0x4f   :  { %3205 = vrot.lane.b32.xlu1 %v3204_v45, %s3661_s30 }
  0x52   :  { %3210 = vrot.lane.b32.xlu0 %v3199_v44, %s3662_s6 }
  0x53   :  { %3215 = vrot.lane.b32.xlu1 %v3204_v45, %s3662_s6 }
  0x56   :  { %3220 = vrot.lane.b32.xlu0 %v3219_v48, %s3665_s21 }
  0x57   :  { %3225 = vrot.lane.b32.xlu1 %v3224_v51, %s3665_s21 }
  0x5a   :  { %3230 = vrot.lane.b32.xlu0 %v3229_v52, %s3665_s21 }
  0x5b   :  { %3235 = vrot.lane.b32.xlu1 %v3199_v44, %s3663_s7 }
  0x5e   :  { %3240 = vrot.lane.b32.xlu0 %v3204_v45, %s3663_s7 }
  0x5f   :  { %3245 = vrot.lane.b32.xlu1 %v3219_v48, %s3666_s22 }
  0x62   :  { %3250 = vrot.lane.b32.xlu0 %v3224_v51, %s3666_s22 }
  0x63   :  { %3255 = vrot.lane.b32.xlu1 %v3229_v52, %s3666_s22 }
  0x66   :  { %3260 = vrot.lane.b32.xlu0 %v3199_v44, %s3664_s12 }
  0x67   :  { %3265 = vrot.lane.b32.xlu1 %v3204_v45, %s3664_s12 }
  0x6a   :  { %3270 = vrot.lane.b32.xlu0 %v3219_v48, %s3667_s23 }
  0x6b   :  { %3275 = vrot.lane.b32.xlu1 %v3224_v51, %s3667_s23 }
  0x6e   :  { %3280 = vrot.lane.b32.xlu0 %v3229_v52, %s3667_s23 }
  0x6f   :  { %3285 = vrot.lane.b32.xlu1 %v3219_v48, %s3668_s24 }
  0x72   :  { %3290 = vrot.lane.b32.xlu0 %v3224_v51, %s3668_s24 }
  0x73   :  { %3295 = vrot.lane.b32.xlu1 %v3229_v52, %s3668_s24  ;;  %v3670_v52 = vmov 0.0  }
  0x76   :  { %3300 = vrot.lane.b32.xlu0 %v3299_v57, %s3665_s21 }
  0x77   :  { %3305 = vrot.lane.b32.xlu1 %v3304_v58, %s3665_s21 }
  0x78   :  { %v3851_v59 = vpop.permute.xlu0 %3020 }
  0x79   :  { %v3031_v60 = vpop.permute.xlu1 %3030  ;;  %v3023_v61 = vunpack.i.h.bf16 %v3851_v59  ;;  %v3022_v62 = vunpack.i.l.bf16 %v3851_v59 }
  0x7a   :  { %v3032_v63 = vunpack.i.l.bf16 %v3031_v60  ;;  %3310 = vrot.lane.b32.xlu0 %v3299_v57, %s3666_s22  ;;  %v3033_v1 = vunpack.i.h.bf16 %v3031_v60 }
  0x7b   :  { %3315 = vrot.lane.b32.xlu1 %v3304_v58, %s3666_s22  ;;  %v138_v7 = vsel %vm136_vm1, %v3022_v62, %v3023_v61 }
  0x7c   :  { %v3857_v0 = vpop.permute.xlu0 %3025  ;;  %v137_v8 = vsel %vm136_vm1, %v3032_v63, %v3022_v62 }
  0x7d   :  { %v3028_v2 = vunpack.i.h.bf16 %v3857_v0  ;;  %v3027_v5 = vunpack.i.l.bf16 %v3857_v0  ;;  %v3861_v6 = vpop.permute.xlu1 %3035 }
  0x7e   :  { %3320 = vrot.lane.b32.xlu0 %v3299_v57, %s3667_s23  ;;  %v3038_v9 = vunpack.i.h.bf16 %v3861_v6  ;;  %v3037_v12 = vunpack.i.l.bf16 %v3861_v6 }
  0x7f   :  { %3325 = vrot.lane.b32.xlu1 %v3304_v58, %s3667_s23  ;;  %v141_v13 = vsel %vm136_vm1, %v3027_v5, %v3028_v2  ;;  %v140_v14 = vsel %vm136_vm1, %v3033_v1, %v3027_v5 }
  0x80   :  { %v3875_v15 = vpop.permute.xlu0 %3040  ;;  %v2793_v16 = vpack.c.bf16 %v141_v13, %v138_v7  ;;  %v2795_v18 = vpack.c.bf16 %v140_v14, %v137_v8  ;;  %v197_v25 = vsel %vm195_vm2, %v3037_v12, %v3038_v9 }
  0x81   :  { %v3043_v20 = vunpack.i.h.bf16 %v3875_v15  ;;  %v3042_v21 = vunpack.i.l.bf16 %v3875_v15  ;;  %v3046_v22 = vpop.permute.xlu1 %3045 }
  0x82   :  { %v3048_v23 = vunpack.i.h.bf16 %v3046_v22  ;;  %v3047_v24 = vunpack.i.l.bf16 %v3046_v22  ;;  %3330 = vrot.lane.b32.xlu0 %v3299_v57, %s3668_s24  ;;  %2794 = vmatprep.subr.bf16.mxu0 %v2793_v16 }
  0x83   :  { %3335 = vrot.lane.b32.xlu1 %v3304_v58, %s3668_s24  ;;  %2796 = vmatpush1.bf16.msra.mxu0 %v2795_v18  ;;  %v200_v26 = vsel %vm195_vm2, %v3042_v21, %v3043_v20 }
  0x84   :  { %v3887_v27 = vpop.permute.xlu0 %3050  ;;  %v2797_v28 = vpack.c.bf16 %v200_v26, %v197_v25  ;;  %v196_v29 = vsel %vm195_vm2, %v3047_v24, %v3037_v12  ;;  %v199_v30 = vsel %vm195_vm2, %v3048_v23, %v3042_v21 }
  0x85   :  { %v3053_v34 = vunpack.i.h.bf16 %v3887_v27  ;;  %v3052_v35 = vunpack.i.l.bf16 %v3887_v27  ;;  %v3899_v36 = vpop.permute.xlu1 %3055  ;;  %v2799_v37 = vpack.c.bf16 %v199_v30, %v196_v29 }
  0x86   :  { %v3058_v38 = vunpack.i.h.bf16 %v3899_v36  ;;  %v3057_v39 = vunpack.i.l.bf16 %v3899_v36  ;;  %2798 = vmatprep.subr.bf16.mxu0 %v2797_v28  ;;  %1185 = vperm.xlu0 %3339, %v1181_v32  }
  0x87   :  { %2800 = vmatpush1.bf16.msra.mxu0 %v2799_v37  ;;  %v256_v40 = vsel %vm254_vm3, %v3052_v35, %v3053_v34  ;;  %1190 = vperm.xlu1 %3340, %v1182_v33  }
  0x88   :  { %v3061_v42 = vpop.permute.xlu0 %3060  ;;  %v259_v43 = vsel %vm254_vm3, %v3057_v39, %v3058_v38 }
  0x89   :  { %v3063_v44 = vunpack.i.h.bf16 %v3061_v42  ;;  %v3062_v45 = vunpack.i.l.bf16 %v3061_v42  ;;  %v3909_v46 = vpop.permute.xlu1 %3065  ;;  %v2801_v47 = vpack.c.bf16 %v259_v43, %v256_v40 }
  0x8a   :  { %v3068_v48 = vunpack.i.h.bf16 %v3909_v46  ;;  %v3067_v49 = vunpack.i.l.bf16 %v3909_v46  ;;  %v4107_v46 = vld [vmem:[%s5005_s1 + $0x10] sm:$0xff]  ;;  %3347 = vrot.lane.b32.xlu0 %v3670_v52, %s3662_s6 }
  0x8b   :  { %2802 = vmatprep.subr.bf16.mxu0 %v2801_v47  ;;  %v255_v50 = vsel %vm254_vm3, %v3062_v45, %v3052_v35  ;;  %v258_v51 = vsel %vm254_vm3, %v3063_v44, %v3057_v39  ;;  %3342 = vrot.lane.b32.xlu1 %v3670_v52, %s3661_s30 }
  0x8c   :  { %v3917_v53 = vpop.permute.xlu0 %3070  ;;  %v2803_v54 = vpack.c.bf16 %v258_v51, %v255_v50  ;;  %v315_v62 = vsel %vm313_vm4, %v3067_v49, %v3068_v48 }
  0x8d   :  { %v3073_v55 = vunpack.i.h.bf16 %v3917_v53  ;;  %v3072_v56 = vunpack.i.l.bf16 %v3917_v53  ;;  %v3076_v57 = vpop.permute.xlu1 %3075 }
  0x8e   :  { %v3078_v58 = vunpack.i.h.bf16 %v3076_v57  ;;  %v3077_v60 = vunpack.i.l.bf16 %v3076_v57  ;;  %2804 = vmatpush1.bf16.msra.mxu0 %v2803_v54  ;;  %3357 = vrot.lane.b32.xlu0 %v3670_v52, %s3664_s12 }
  0x8f   :  { %v318_v63 = vsel %vm313_vm4, %v3072_v56, %v3073_v55  ;;  %3352 = vrot.lane.b32.xlu1 %v3670_v52, %s3663_s7 }
  0x90   :  { %v3927_v1 = vpop.permute.xlu0 %3080  ;;  %v2805_v5 = vpack.c.bf16 %v318_v63, %v315_v62  ;;  %v314_v7 = vsel %vm313_vm4, %v3077_v60, %v3067_v49  ;;  %v317_v8 = vsel %vm313_vm4, %v3078_v58, %v3072_v56 }
  0x91   :  { %v3083_v12 = vunpack.i.h.bf16 %v3927_v1  ;;  %v3082_v13 = vunpack.i.l.bf16 %v3927_v1  ;;  %v3933_v14 = vpop.permute.xlu1 %3085  ;;  %v2807_v16 = vpack.c.bf16 %v317_v8, %v314_v7 }
  0x92   :  { %v3088_v18 = vunpack.i.h.bf16 %v3933_v14  ;;  %v3087_v21 = vunpack.i.l.bf16 %v3933_v14  ;;  %2806 = vmatprep.subr.bf16.mxu0 %v2805_v5 }
  0x93   :  { %2808 = vmatpush1.bf16.msra.mxu0 %v2807_v16  ;;  %v392_v22 = vsel %vm390_vm5, %v3082_v13, %v3083_v12  ;;  %3362 = vrot.lane.b32.xlu1 %v3670_v52, %s3665_s21 }
  0x94   :  { %v3091_v23 = vpop.permute.xlu0 %3090  ;;  %2810 = vmatprep.subr.bf16.mxu0 %v2809_v17  ;;  %v395_v24 = vsel %vm390_vm5, %v3087_v21, %v3088_v18 }
  0x95   :  { %v3093_v25 = vunpack.i.h.bf16 %v3091_v23  ;;  %v3092_v26 = vunpack.i.l.bf16 %v3091_v23  ;;  %v3946_v28 = vpop.permute.xlu1 %3095  ;;  %v2813_v29 = vpack.c.bf16 %v395_v24, %v392_v22 }
  0x96   :  { %v3098_v30 = vunpack.i.h.bf16 %v3946_v28  ;;  %v3097_v31 = vunpack.i.l.bf16 %v3946_v28 }
  0x97   :  { %2812 = vmatpush1.bf16.msra.mxu0 %v2811_v19  ;;  %v391_v4 = vsel %vm390_vm5, %v3092_v26, %v3082_v13  ;;  %v394_v11 = vsel %vm390_vm5, %v3093_v25, %v3087_v21 }
  0x98   :  { %v3955_v17 = vpop.permute.xlu0 %3100  ;;  %2814 = vmatprep.subr.bf16.mxu0 %v2813_v29  ;;  %v2815_v32 = vpack.c.bf16 %v394_v11, %v391_v4  ;;  %v627_v3 = vsel %vm136_vm1, %v3097_v31, %v3098_v30 }
  0x99   :  { %v3103_v33 = vunpack.i.h.bf16 %v3955_v17  ;;  %v3102_v35 = vunpack.i.l.bf16 %v3955_v17  ;;  %v3106_v37 = vpop.permute.xlu1 %3105 }
  0x9a   :  { %v3108_v39 = vunpack.i.h.bf16 %v3106_v37  ;;  %v3107_v40 = vunpack.i.l.bf16 %v3106_v37 }
  0x9b   :  { %2816 = vmatpush1.bf16.msra.mxu0 %v2815_v32  ;;  %v630_v10 = vsel %vm136_vm1, %v3102_v35, %v3103_v33 }
  0x9c   :  { %v3965_v19 = vpop.permute.xlu0 %3110  ;;  %v2829_v42 = vpack.c.bf16 %v630_v10, %v627_v3  ;;  %v139_v43 = vsel %vm136_vm1, %v3023_v61, %v3107_v40  ;;  %v142_v44 = vsel %vm136_vm1, %v3028_v2, %v3108_v39 }
  0x9d   :  { %v3113_v45 = vunpack.i.h.bf16 %v3965_v19  ;;  %v3112_v47 = vunpack.i.l.bf16 %v3965_v19  ;;  %v3975_v49 = vpop.permute.xlu1 %3115  ;;  %v2831_v50 = vpack.c.bf16 %v142_v44, %v139_v43 }
  0x9e   :  { %v3118_v51 = vunpack.i.h.bf16 %v3975_v49  ;;  %v3117_v54 = vunpack.i.l.bf16 %v3975_v49  ;;  %2830 = vmatprep.subr.bf16.mxu1 %v2829_v42 }
  0x9f   :  { %2832 = vmatpush1.bf16.msra.mxu1 %v2831_v50  ;;  %v451_v59 = vsel %vm449_vm6, %v3112_v47, %v3113_v45 }
  0xa0   :  { %v3121_v61 = vpop.permute.xlu0 %3120  ;;  %v454_v0 = vsel %vm449_vm6, %v3117_v54, %v3118_v51 }
  0xa1   :  { %v3123_v2 = vunpack.i.h.bf16 %v3121_v61  ;;  %v3122_v56 = vunpack.i.l.bf16 %v3121_v61  ;;  %v3985_v57 = vpop.permute.xlu1 %3125  ;;  %v2817_v58 = vpack.c.bf16 %v454_v0, %v451_v59 }
  0xa2   :  { %v3128_v60 = vunpack.i.h.bf16 %v3985_v57  ;;  %v3127_v62 = vunpack.i.l.bf16 %v3985_v57 }
  0xa3   :  { %2818 = vmatprep.subr.bf16.mxu0 %v2817_v58  ;;  %v450_v63 = vsel %vm449_vm6, %v3122_v56, %v3112_v47  ;;  %v453_v5 = vsel %vm449_vm6, %v3123_v2, %v3117_v54 }
  0xa4   :  { %v3991_v7 = vpop.permute.xlu0 %3130  ;;  %v2819_v8 = vpack.c.bf16 %v453_v5, %v450_v63  ;;  %v685_v24 = vsel %vm195_vm2, %v3127_v62, %v3128_v60 }
  0xa5   :  { %v3133_v13 = vunpack.i.h.bf16 %v3991_v7  ;;  %v3132_v16 = vunpack.i.l.bf16 %v3991_v7  ;;  %v3136_v21 = vpop.permute.xlu1 %3135 }
  0xa6   :  { %v3138_v22 = vunpack.i.h.bf16 %v3136_v21  ;;  %v3137_v23 = vunpack.i.l.bf16 %v3136_v21  ;;  %2820 = vmatpush1.bf16.msra.mxu0 %v2819_v8 }
  0xa7   :  { %v688_v25 = vsel %vm195_vm2, %v3132_v16, %v3133_v13 }
  0xa8   :  { %v4001_v26 = vpop.permute.xlu0 %3140  ;;  %v2833_v29 = vpack.c.bf16 %v688_v25, %v685_v24  ;;  %v198_v31 = vsel %vm195_vm2, %v3038_v9, %v3137_v23  ;;  %v201_v4 = vsel %vm195_vm2, %v3043_v20, %v3138_v22 }
  0xa9   :  { %v3143_v11 = vunpack.i.h.bf16 %v4001_v26  ;;  %v3142_v32 = vunpack.i.l.bf16 %v4001_v26  ;;  %v4011_v35 = vpop.permute.xlu1 %3145  ;;  %v2835_v37 = vpack.c.bf16 %v201_v4, %v198_v31 }
  0xaa   :  { %v3148_v39 = vunpack.i.h.bf16 %v4011_v35  ;;  %v3147_v40 = vunpack.i.l.bf16 %v4011_v35  ;;  %2834 = vmatprep.subr.bf16.mxu1 %v2833_v29 }
  0xab   :  { %2836 = vmatpush1.bf16.msra.mxu1 %v2835_v37  ;;  %v510_v6 = vsel %vm508_vm7, %v3142_v32, %v3143_v11 }
  0xac   :  { %v3151_v9 = vpop.permute.xlu0 %3150  ;;  %v513_v15 = vsel %vm508_vm7, %v3147_v40, %v3148_v39 }
  0xad   :  { %v3153_v20 = vunpack.i.h.bf16 %v3151_v9  ;;  %v3152_v3 = vunpack.i.l.bf16 %v3151_v9  ;;  %v4021_v10 = vpop.permute.xlu1 %3155  ;;  %v2821_v42 = vpack.c.bf16 %v513_v15, %v510_v6  ;;  %v2734_v6 = vld [vmem:[%s5004_s0 + $0x80] sm:$0xff] }
  0xae   :  { %v3158_v43 = vunpack.i.h.bf16 %v4021_v10  ;;  %v3157_v44 = vunpack.i.l.bf16 %v4021_v10  ;;  %v2733_v10 = vld [vmem:[%s5004_s0 + $0x68] sm:$0xff] }
  0xaf   :  { %2822 = vmatprep.subr.bf16.mxu0 %v2821_v42  ;;  %v509_v47 = vsel %vm508_vm7, %v3152_v3, %v3142_v32  ;;  %v512_v50 = vsel %vm508_vm7, %v3153_v20, %v3147_v40  ;;  %v2731_v40 = vld [vmem:[%s5004_s0 + $0x58] sm:$0xff] }
  0xb0   :  { %v4027_v54 = vpop.permute.xlu0 %3160  ;;  %v2823_v59 = vpack.c.bf16 %v512_v50, %v509_v47  ;;  %v743_v62 = vsel %vm254_vm3, %v3157_v44, %v3158_v43  ;;  %v825_v47 = vmax.f32 %v2731_v40, 0.0  ;;  %v828_v50 = vmax.f32 %v2734_v6, 0.0 }
  0xb1   :  { %v3163_v61 = vunpack.i.h.bf16 %v4027_v54  ;;  %v3162_v0 = vunpack.i.l.bf16 %v4027_v54  ;;  %v3166_v2 = vpop.permute.xlu1 %3165 }
  0xb2   :  { %v3168_v56 = vunpack.i.h.bf16 %v3166_v2  ;;  %v3167_v58 = vunpack.i.l.bf16 %v3166_v2  ;;  %2824 = vmatpush1.bf16.msra.mxu0 %v2823_v59  ;;  %v334_v59 = vld [vmem:[%s5004_s0 + $0x18] sm:$0xff] }
  0xb3   :  { %v746_v63 = vsel %vm254_vm3, %v3162_v0, %v3163_v61  ;;  %v337_v0 = vld [vmem:[%s5004_s0 + $0x40] sm:$0xff] }
  0xb4   :  { %v4037_v5 = vpop.permute.xlu0 %3170  ;;  %v2837_v8 = vpack.c.bf16 %v746_v63, %v743_v62  ;;  %v257_v16 = vsel %vm254_vm3, %v3053_v34, %v3167_v58  ;;  %v260_v21 = vsel %vm254_vm3, %v3058_v38, %v3168_v56 }
  0xb5   :  { %v3173_v22 = vunpack.i.h.bf16 %v4037_v5  ;;  %v3172_v23 = vunpack.i.l.bf16 %v4037_v5  ;;  %v4047_v24 = vpop.permute.xlu1 %3175  ;;  %v2839_v25 = vpack.c.bf16 %v260_v21, %v257_v16 }
  0xb6   :  { %v3178_v29 = vunpack.i.h.bf16 %v4047_v24  ;;  %v3177_v31 = vunpack.i.l.bf16 %v4047_v24  ;;  %2838 = vmatprep.subr.bf16.mxu1 %v2837_v8  ;;  %v4082_v8 = vld [vmem:[%s5005_s1] sm:$0xff] }
  0xb7   :  { %2840 = vmatpush1.bf16.msra.mxu1 %v2839_v25  ;;  %v569_v27 = vsel %vm567_vm8, %v3172_v23, %v3173_v22  ;;  %v343_v25 = vmax.f32 %v337_v0, 0.0 }
  0xb8   :  { %v3181_v34 = vpop.permute.xlu0 %3180  ;;  %v572_v36 = vsel %vm567_vm8, %v3177_v31, %v3178_v29 }
  0xb9   :  { %v3183_v38 = vunpack.i.h.bf16 %v3181_v34  ;;  %v3182_v4 = vunpack.i.l.bf16 %v3181_v34  ;;  %v4057_v32 = vpop.permute.xlu1 %3185  ;;  %v2825_v37 = vpack.c.bf16 %v572_v36, %v569_v27 }
  0xba   :  { %v3188_v9 = vunpack.i.h.bf16 %v4057_v32  ;;  %v3187_v15 = vunpack.i.l.bf16 %v4057_v32 }
  0xbb   :  { %2826 = vmatprep.subr.bf16.mxu0 %v2825_v37  ;;  %v568_v20 = vsel %vm567_vm8, %v3182_v4, %v3172_v23  ;;  %v571_v3 = vsel %vm567_vm8, %v3183_v38, %v3177_v31  ;;  %v340_v23 = vmax.f32 %v334_v59, 0.0  ;;  %v4093_v31 = vld [vmem:[%s5005_s1 + $0x18] sm:$0xff]  ;;  %v2845_v4 = vpack.c.bf16 %v828_v50, %v825_v47 }
  0xbc   :  { %v4069_v42 = vpop.permute.xlu0 %3190  ;;  %v2827_v44 = vpack.c.bf16 %v571_v3, %v568_v20  ;;  %v801_v16 = vsel %vm313_vm4, %v3187_v15, %v3188_v9 }
  0xbd   :  { %v3193_v2 = vunpack.i.h.bf16 %v4069_v42  ;;  %v3192_v56 = vunpack.i.l.bf16 %v4069_v42  ;;  %v3196_v58 = vpop.permute.xlu1 %3195 }
  0xbe   :  { %v3198_v62 = vunpack.i.h.bf16 %v3196_v58  ;;  %v3197_v63 = vunpack.i.l.bf16 %v3196_v58  ;;  %2828 = vmatpush1.bf16.msra.mxu0 %v2827_v44 }
  0xbf   :  { %v804_v21 = vsel %vm313_vm4, %v3192_v56, %v3193_v2 }
  0xc0   :  { %v3201_v27 = vpop.permute.xlu0 %3200  ;;  %v2841_v34 = vpack.c.bf16 %v804_v21, %v801_v16  ;;  %v316_v36 = vsel %vm313_vm4, %v3068_v48, %v3197_v63  ;;  %v319_v38 = vsel %vm313_vm4, %v3073_v55, %v3198_v62  ;;  %v2847_v55 = vpack.c.bf16 %v343_v25, %v340_v23 }
  0xc1   :  { %v3203_v37 = vunpack.i.h.bf16 %v3201_v27  ;;  %v3202_v40 = vunpack.i.l.bf16 %v3201_v27  ;;  %v3206_v6 = vpop.permute.xlu1 %3205  ;;  %v2843_v15 = vpack.c.bf16 %v319_v38, %v316_v36  ;;  %1265 = vmatmul.mubr.f32.vlgmr.msra.gmra.mrb[0].mxu0 %v4082_v8 }
  0xc2   :  { %v3208_v20 = vunpack.i.h.bf16 %v3206_v6  ;;  %v3207_v3 = vunpack.i.l.bf16 %v3206_v6  ;;  %2842 = vmatprep.subr.bf16.mxu1 %v2841_v34  ;;  %2770 = vmatprep.mubr.msk.f32.mxu0 %vm1193_vm0, %v4093_v31 }
  0xc3   :  { %v628_v48 = vsel %vm136_vm1, %v3098_v30, %v3202_v40  ;;  %2844 = vmatpush1.bf16.msra.mxu1 %v2843_v15  ;;  %v629_v53 = vsel %vm136_vm1, %v3202_v40, %v3203_v37 }
  0xc4   :  { %v631_v44 = vsel %vm136_vm1, %v3103_v33, %v3207_v3  ;;  %v3211_v47 = vpop.permute.xlu0 %3210  ;;  %v632_v50 = vsel %vm136_vm1, %v3207_v3, %v3208_v20  ;;  %2846 = vmatprep.subr.bf16.mxu1 %v2845_v4 }
  0xc5   :  { %v2867_v59 = vpack.c.bf16 %v631_v44, %v628_v48  ;;  %v3213_v0 = vunpack.i.h.bf16 %v3211_v47  ;;  %v3212_v56 = vunpack.i.l.bf16 %v3211_v47  ;;  %v3216_v58 = vpop.permute.xlu1 %3215  ;;  %v2865_v62 = vpack.c.bf16 %v632_v50, %v629_v53  ;;  %1271 = vmatmul.mubr.f32.gmra.mrb[2].mxu0 %v4107_v46 }
  0xc6   :  { %v3218_v28 = vunpack.i.h.bf16 %v3216_v58  ;;  %v3217_v30 = vunpack.i.l.bf16 %v3216_v58  ;;  %2773 = vmatprep.mubr.msk.f32.mxu0 %vm1193_vm0, %v3808_v41 }
  0xc7   :  { %v686_v17 = vsel %vm195_vm2, %v3128_v60, %v3212_v56  ;;  %2866 = vmatprep.subr.bf16.mxu0 %v2865_v62  ;;  %v687_v33 = vsel %vm195_vm2, %v3212_v56, %v3213_v0  ;;  %2848 = vmatpush1.bf16.msra.mxu1 %v2847_v55 }
  0xc8   :  { %v689_v63 = vsel %vm195_vm2, %v3133_v13, %v3217_v30  ;;  %2868 = vmatpush1.bf16.msra.mxu0 %v2867_v59  ;;  %v4127_v16 = vpop.permute.xlu0 %3220  ;;  %v690_v21 = vsel %vm195_vm2, %v3217_v30, %v3218_v28 }
  0xc9   :  { %v2871_v23 = vpack.c.bf16 %v689_v63, %v686_v17  ;;  %v3223_v41 = vunpack.i.h.bf16 %v4127_v16  ;;  %v3222_v57 = vunpack.i.l.bf16 %v4127_v16  ;;  %v4132_v25 = vpop.permute.xlu1 %3225  ;;  %v2869_v60 = vpack.c.bf16 %v690_v21, %v687_v33 }
  0xca   :  { %v3228_v27 = vunpack.i.h.bf16 %v4132_v25  ;;  %v3227_v34 = vunpack.i.l.bf16 %v4132_v25  ;;  %v827_v63 = vmax.f32 %v2733_v10, 0.0 }
  0xcb   :  { %2870 = vmatprep.subr.bf16.mxu0 %v2869_v60  ;;  %v877_v7 = vsel %vm390_vm5, %v3222_v57, %v3223_v41 }
  0xcc   :  { %2872 = vmatpush1.bf16.msra.mxu0 %v2871_v23  ;;  %v3231_v13 = vpop.permute.xlu0 %3230  ;;  %v880_v36 = vsel %vm390_vm5, %v3227_v34, %v3228_v27 }
  0xcd   :  { %v3233_v38 = vunpack.i.h.bf16 %v3231_v13  ;;  %v3232_v4 = vunpack.i.l.bf16 %v3231_v13  ;;  %v3236_v37 = vpop.permute.xlu1 %3235  ;;  %v2849_v40 = vpack.c.bf16 %v880_v36, %v877_v7  ;;  %v2732_v7 = vld [vmem:[%s5004_s0 + $0x60] sm:$0xff] }
  0xce   :  { %v3238_v6 = vunpack.i.h.bf16 %v3236_v37  ;;  %v3237_v15 = vunpack.i.l.bf16 %v3236_v37  ;;  %v2735_v37 = vld [vmem:[%s5004_s0 + $0x88] sm:$0xff] }
  0xcf   :  { %2850 = vmatprep.subr.bf16.mxu1 %v2849_v40  ;;  %v393_v20 = vsel %vm390_vm5, %v3083_v12, %v3232_v4  ;;  %v396_v3 = vsel %vm390_vm5, %v3088_v18, %v3233_v38 }
  0xd0   :  { %v3241_v48 = vpop.permute.xlu0 %3240  ;;  %v2851_v53 = vpack.c.bf16 %v396_v3, %v393_v20  ;;  %v744_v50 = vsel %vm254_vm3, %v3158_v43, %v3237_v15  ;;  %v745_v59 = vsel %vm254_vm3, %v3237_v15, %v3238_v6 }
  0xd1   :  { %v3243_v55 = vunpack.i.h.bf16 %v3241_v48  ;;  %v3242_v44 = vunpack.i.l.bf16 %v3241_v48  ;;  %v4148_v47 = vpop.permute.xlu1 %3245  ;;  %v829_v48 = vmax.f32 %v2735_v37, 0.0 }
  0xd2   :  { %2852 = vmatpush1.bf16.msra.mxu1 %v2851_v53  ;;  %v3248_v12 = vunpack.i.h.bf16 %v4148_v47  ;;  %v3247_v14 = vunpack.i.l.bf16 %v4148_v47 }
  0xd3   :  { %v747_v1 = vsel %vm254_vm3, %v3163_v61, %v3242_v44  ;;  %v748_v18 = vsel %vm254_vm3, %v3242_v44, %v3243_v55  ;;  %v2736_v61 = vld [vmem:[%s5004_s0 + $0x90] sm:$0xff] }
  0xd4   :  { %v2875_v0 = vpack.c.bf16 %v747_v1, %v744_v50  ;;  %v4160_v56 = vpop.permute.xlu0 %3250  ;;  %v2873_v58 = vpack.c.bf16 %v748_v18, %v745_v59  ;;  %v935_v17 = vsel %vm449_vm6, %v3247_v14, %v3248_v12  ;;  %v830_v34 = vmax.f32 %v2736_v61, 0.0 }
  0xd5   :  { %v3253_v43 = vunpack.i.h.bf16 %v4160_v56  ;;  %v3252_v54 = vunpack.i.l.bf16 %v4160_v56  ;;  %v3256_v62 = vpop.permute.xlu1 %3255 }
  0xd6   :  { %v3258_v28 = vunpack.i.h.bf16 %v3256_v62  ;;  %v3257_v30 = vunpack.i.l.bf16 %v3256_v62  ;;  %2874 = vmatprep.subr.bf16.mxu0 %v2873_v58  ;;  %v2881_v3 = vpack.c.bf16 %v830_v34, %v827_v63 }
  0xd7   :  { %2876 = vmatpush1.bf16.msra.mxu0 %v2875_v0  ;;  %v938_v33 = vsel %vm449_vm6, %v3252_v54, %v3253_v43 }
  0xd8   :  { %v3261_v21 = vpop.permute.xlu0 %3260  ;;  %v2853_v23 = vpack.c.bf16 %v938_v33, %v935_v17  ;;  %v452_v57 = vsel %vm449_vm6, %v3113_v45, %v3257_v30  ;;  %v455_v60 = vsel %vm449_vm6, %v3118_v51, %v3258_v28  ;;  %v826_v51 = vmax.f32 %v2732_v7, 0.0 }
  0xd9   :  { %v3263_v13 = vunpack.i.h.bf16 %v3261_v21  ;;  %v3262_v36 = vunpack.i.l.bf16 %v3261_v21  ;;  %v3266_v38 = vpop.permute.xlu1 %3265  ;;  %v2855_v4 = vpack.c.bf16 %v455_v60, %v452_v57 }
  0xda   :  { %v3268_v19 = vunpack.i.h.bf16 %v3266_v38  ;;  %v3267_v40 = vunpack.i.l.bf16 %v3266_v38  ;;  %2854 = vmatprep.subr.bf16.mxu1 %v2853_v23  ;;  %v2883_v14 = vpack.c.bf16 %v829_v48, %v826_v51 }
  0xdb   :  { %v802_v45 = vsel %vm313_vm4, %v3188_v9, %v3262_v36  ;;  %2856 = vmatpush1.bf16.msra.mxu1 %v2855_v4  ;;  %v803_v49 = vsel %vm313_vm4, %v3262_v36, %v3263_v13 }
  0xdc   :  { %v805_v6 = vsel %vm313_vm4, %v3193_v2, %v3267_v40  ;;  %v4195_v15 = vpop.permute.xlu0 %3270  ;;  %v806_v20 = vsel %vm313_vm4, %v3267_v40, %v3268_v19 }
  0xdd   :  { %v2879_v53 = vpack.c.bf16 %v805_v6, %v802_v45  ;;  %v3273_v55 = vunpack.i.h.bf16 %v4195_v15  ;;  %v3272_v32 = vunpack.i.l.bf16 %v4195_v15  ;;  %v4200_v9 = vpop.permute.xlu1 %3275  ;;  %v2877_v44 = vpack.c.bf16 %v806_v20, %v803_v49 }
  0xde   :  { %v3278_v50 = vunpack.i.h.bf16 %v4200_v9  ;;  %v3277_v42 = vunpack.i.l.bf16 %v4200_v9 }
  0xdf   :  { %2878 = vmatprep.subr.bf16.mxu0 %v2877_v44  ;;  %v993_v2 = vsel %vm508_vm7, %v3272_v32, %v3273_v55 }
  0xe0   :  { %2880 = vmatpush1.bf16.msra.mxu0 %v2879_v53  ;;  %v3281_v59 = vpop.permute.xlu0 %3280  ;;  %v996_v1 = vsel %vm508_vm7, %v3277_v42, %v3278_v50 }
  0xe1   :  { %v3283_v18 = vunpack.i.h.bf16 %v3281_v59  ;;  %v3282_v0 = vunpack.i.l.bf16 %v3281_v59  ;;  %v4210_v58 = vpop.permute.xlu1 %3285  ;;  %v2857_v10 = vpack.c.bf16 %v996_v1, %v993_v2  ;;  %2882 = vmatprep.subr.bf16.mxu0 %v2881_v3 }
  0xe2   :  { %v3288_v54 = vunpack.i.h.bf16 %v4210_v58  ;;  %v3287_v62 = vunpack.i.l.bf16 %v4210_v58  ;;  %v20_v58 = vlaneseq }
  0xe3   :  { %2858 = vmatprep.subr.bf16.mxu1 %v2857_v10  ;;  %v511_v61 = vsel %vm508_vm7, %v3143_v11, %v3282_v0  ;;  %v514_v28 = vsel %vm508_vm7, %v3148_v39, %v3283_v18 }
  0xe4   :  { %v4220_v30 = vpop.permute.xlu0 %3290  ;;  %v2859_v17 = vpack.c.bf16 %v514_v28, %v511_v61  ;;  %2884 = vmatpush1.bf16.msra.mxu0 %v2883_v14  ;;  %v1051_v26 = vsel %vm567_vm8, %v3287_v62, %v3288_v54 }
  0xe5   :  { %v3293_v33 = vunpack.i.h.bf16 %v4220_v30  ;;  %v3292_v63 = vunpack.i.l.bf16 %v4220_v30  ;;  %v3296_v21 = vpop.permute.xlu1 %3295 }
  0xe6   :  { %v3298_v23 = vunpack.i.h.bf16 %v3296_v21  ;;  %v3297_v57 = vunpack.i.l.bf16 %v3296_v21  ;;  %2860 = vmatpush1.bf16.msra.mxu1 %v2859_v17 }
  0xe7   :  { %v1054_v11 = vsel %vm567_vm8, %v3292_v63, %v3293_v33 }
  0xe8   :  { %v3301_v35 = vpop.permute.xlu0 %3300  ;;  %v2861_v39 = vpack.c.bf16 %v1054_v11, %v1051_v26  ;;  %v570_v60 = vsel %vm567_vm8, %v3173_v22, %v3297_v57  ;;  %v573_v34 = vsel %vm567_vm8, %v3178_v29, %v3298_v23 }
  0xe9   :  { %v3303_v7 = vunpack.i.h.bf16 %v3301_v35  ;;  %v3302_v13 = vunpack.i.l.bf16 %v3301_v35  ;;  %v3306_v36 = vpop.permute.xlu1 %3305  ;;  %v2863_v38 = vpack.c.bf16 %v573_v34, %v570_v60 }
  0xea   :  { %v3308_v4 = vunpack.i.h.bf16 %v3306_v36  ;;  %v3307_v37 = vunpack.i.l.bf16 %v3306_v36  ;;  %2862 = vmatprep.subr.bf16.mxu1 %v2861_v39 }
  0xeb   :  { %v878_v19 = vsel %vm390_vm5, %v3223_v41, %v3302_v13  ;;  %2864 = vmatpush1.bf16.msra.mxu1 %v2863_v38  ;;  %v879_v5 = vsel %vm390_vm5, %v3302_v13, %v3303_v7 }
  0xec   :  { %v881_v22 = vsel %vm390_vm5, %v3228_v27, %v3307_v37  ;;  %v3311_v24 = vpop.permute.xlu0 %3310  ;;  %v882_v29 = vsel %vm390_vm5, %v3307_v37, %v3308_v4 }
  0xed   :  { %v2887_v40 = vpack.c.bf16 %v881_v22, %v878_v19  ;;  %v3313_v45 = vunpack.i.h.bf16 %v3311_v24  ;;  %v3312_v49 = vunpack.i.l.bf16 %v3311_v24  ;;  %v3316_v51 = vpop.permute.xlu1 %3315  ;;  %v2885_v6 = vpack.c.bf16 %v882_v29, %v879_v5 }
  0xee   :  { %v3318_v20 = vunpack.i.h.bf16 %v3316_v51  ;;  %v3317_v3 = vunpack.i.l.bf16 %v3316_v51  ;;  %1342 = vmatmul.mubr.f32.vlgmr.msra.gmra.mrb[0].mxu1 %v4082_v8 }
  0xef   :  { %v936_v16 = vsel %vm449_vm6, %v3248_v12, %v3312_v49  ;;  %2886 = vmatprep.subr.bf16.mxu0 %v2885_v6  ;;  %2772 = vmatprep.mubr.msk.f32.mxu1 %vm1193_vm0, %v4093_v31  ;;  %v937_v41 = vsel %vm449_vm6, %v3312_v49, %v3313_v45 }
  0xf0   :  { %v939_v25 = vsel %vm449_vm6, %v3253_v43, %v3317_v3  ;;  %2888 = vmatpush1.bf16.msra.mxu0 %v2887_v40  ;;  %v3321_v27 = vpop.permute.xlu0 %3320  ;;  %v940_v48 = vsel %vm449_vm6, %v3317_v3, %v3318_v20 }
  0xf1   :  { %v2891_v53 = vpack.c.bf16 %v939_v25, %v936_v16  ;;  %v3323_v32 = vunpack.i.h.bf16 %v3321_v27  ;;  %v3322_v44 = vunpack.i.l.bf16 %v3321_v27  ;;  %v3326_v47 = vpop.permute.xlu1 %3325  ;;  %v2889_v42 = vpack.c.bf16 %v940_v48, %v937_v41 }
  0xf2   :  { %v3328_v12 = vunpack.i.h.bf16 %v3326_v47  ;;  %v3327_v2 = vunpack.i.l.bf16 %v3326_v47  ;;  %1348 = vmatmul.mubr.f32.gmra.mrb[2].mxu1 %v4107_v46 }
  0xf3   :  { %v994_v59 = vsel %vm508_vm7, %v3273_v55, %v3322_v44  ;;  %2890 = vmatprep.subr.bf16.mxu0 %v2889_v42  ;;  %v995_v56 = vsel %vm508_vm7, %v3322_v44, %v3323_v32 }
  0xf4   :  { %v997_v43 = vsel %vm508_vm7, %v3278_v50, %v3327_v2  ;;  %2892 = vmatpush1.bf16.msra.mxu0 %v2891_v53  ;;  %v3331_v1 = vpop.permute.xlu0 %3330  ;;  %v998_v14 = vsel %vm508_vm7, %v3327_v2, %v3328_v12 }
  0xf5   :  { %v2895_v18 = vpack.c.bf16 %v997_v43, %v994_v59  ;;  %v3333_v0 = vunpack.i.h.bf16 %v3331_v1  ;;  %v3332_v10 = vunpack.i.l.bf16 %v3331_v1  ;;  %v3336_v62 = vpop.permute.xlu1 %3335  ;;  %v2893_v61 = vpack.c.bf16 %v998_v14, %v995_v56 }
  0xf6   :  { %v3338_v28 = vunpack.i.h.bf16 %v3336_v62  ;;  %v3337_v15 = vunpack.i.l.bf16 %v3336_v62 }
  0xf7   :  { %v1052_v55 = vsel %vm567_vm8, %v3288_v54, %v3332_v10  ;;  %2894 = vmatprep.subr.bf16.mxu0 %v2893_v61  ;;  %v1053_v9 = vsel %vm567_vm8, %v3332_v10, %v3333_v0  ;;  %v21_v54 = vand.u32 127, %v20_v58 }
  0xf8   :  { %v1055_v50 = vsel %vm567_vm8, %v3293_v33, %v3337_v15  ;;  %2896 = vmatpush1.bf16.msra.mxu0 %v2895_v18  ;;  %v1056_v17 = vsel %vm567_vm8, %v3337_v15, %v3338_v28 }
  0xf9   :  { %v2899_v63 = vpack.c.bf16 %v1055_v50, %v1052_v55  ;;  %v2897_v21 = vpack.c.bf16 %v1056_v17, %v1053_v9  ;;  %v27_v30 = vcvt.s32.f32 %v21_v54  ;;  %v23_v53 = vadd.s32 256, %v21_v54 }
  0xfa   :  { %v24_v44 = vadd.s32 384, %v21_v54  ;;  %v25_v43 = vadd.s32 512, %v21_v54  ;;  %v26_v1 = vadd.s32 640, %v21_v54 }
  0xfb   :  { %2898 = vmatprep.subr.bf16.mxu0 %v2897_v21  ;;  %v29_v32 = vcvt.s32.f32 %v23_v53 }
  0xfc   :  { %2900 = vmatpush1.bf16.msra.mxu0 %v2899_v63  ;;  %v30_v42 = vcvt.s32.f32 %v24_v44  ;;  %v31_v0 = vcvt.s32.f32 %v25_v43  ;;  %v32_v10 = vcvt.s32.f32 %v26_v1 }
  0xfd   :  { %v35_v47 = vmul.f32 0.041666668, %v29_v32 }
  0xfe   :  { %v36_v2 = vmul.f32 0.041666668, %v30_v42  ;;  %v37_v61 = vmul.f32 0.041666668, %v31_v0  ;;  %v38_v28 = vmul.f32 0.041666668, %v32_v10 }
  0xff   :  { %1419 = vmatmul.mubr.f32.vlgmr.msra.gmra.mrb[4].mxu0 %v4082_v8  ;;  %v22_v8 = vadd.s32 128, %v21_v54  ;;  %v41_v12 = vfloor.f32 %v35_v47 }
 0x100   :  { %2774 = vmatprep.mubr.msk.f32.mxu0 %vm1193_vm0, %v4093_v31  ;;  %v33_v31 = vmul.f32 0.041666668, %v27_v30  ;;  %v42_v56 = vfloor.f32 %v36_v2  ;;  %v43_v50 = vfloor.f32 %v37_v61  ;;  %v44_v21 = vfloor.f32 %v38_v28 }
 0x101   :  { %v28_v33 = vcvt.s32.f32 %v22_v8  ;;  %v47_v59 = vmul.f32 24.0, %v41_v12 }
 0x102   :  { %v48_v18 = vmul.f32 24.0, %v42_v56 }
 0x103   :  { %1425 = vmatmul.mubr.f32.gmra.mrb[6].mxu0 %v4107_v46  ;;  %v34_v23 = vmul.f32 0.041666668, %v28_v33  ;;  %v39_v46 = vfloor.f32 %v33_v31  ;;  %v53_v14 = vsub.f32 %v29_v32, %v47_v59  ;;  %v49_v31 = vmul.f32 24.0, %v43_v50 }
 0x104   :  { %v54_v62 = vsub.f32 %v30_v42, %v48_v18 }
 0x105   :  { %v40_v57 = vfloor.f32 %v34_v23  ;;  %v45_v26 = vmul.f32 24.0, %v39_v46  ;;  %v4284_v60 = vpop.permute.xlu0 %1185  ;;  %vm59_vm15 = vcmp.gt.f32.partialorder %v53_v14, 0.5 }
 0x106   :  { %v4289_v4 = vpop.permute.xlu1 %1190 }
 0x107   :  { %v46_v11 = vmul.f32 24.0, %v40_v57  ;;  %v51_v35 = vsub.f32 %v27_v30, %v45_v26  ;;  %v50_v26 = vmul.f32 24.0, %v44_v21 }
 0x109   :  { %v52_v39 = vsub.f32 %v28_v33, %v46_v11  ;;  %vm57_vm9 = vcmp.gt.f32.partialorder %v51_v35, 0.5  ;;  %vm63_vm10 = vcmp.lt.f32.partialorder %v51_v35, 16.5  ;;  %v4446_v50 = vpop.permute.xlu0 %3347 }
 0x10a   :  { %vm69_vm13 = vmand %vm57_vm9, %vm63_vm10  ;;  %vm65_vm9 = vcmp.lt.f32.partialorder %v53_v14, 16.5 }
 0x10b   :  { %vm58_vm11 = vcmp.gt.f32.partialorder %v52_v39, 0.5  ;;  %vm64_vm12 = vcmp.lt.f32.partialorder %v52_v39, 16.5  ;;  %v2693_v36 = vsel %vm69_vm13, 1.0, %v3670_v52  ;;  %vm71_vm10 = vmand %vm59_vm15, %vm65_vm9 }
 0x10c   :  { %vm70_vm14 = vmand %vm58_vm11, %vm64_vm12  ;;  %vm60_vm11 = vcmp.gt.f32.partialorder %v54_v62, 0.5  ;;  %vm66_vm12 = vcmp.lt.f32.partialorder %v54_v62, 16.5  ;;  %v2695_v17 = vsel %vm71_vm10, 1.0, %v3670_v52 }
 0x10d   :  { %v2694_v19 = vsel %vm70_vm14, 1.0, %v3670_v52  ;;  %vm72_vm13 = vmand %vm60_vm11, %vm66_vm12 }
 0x10e   :  { %v2696_v23 = vsel %vm72_vm13, 1.0, %v3670_v52 }
 0x194   :  { %v1266_v34 = vpop.f32.mrb[0].mxu0 }
 0x195   :  { %v1267_v7 = vadd.f32 %v1266_v34, %v4284_v60  ;;  %v1268_v13 = vpop.f32.mrb[1].mxu0 }
 0x196   :  { %v1269_v38 = vadd.f32 %v1268_v13, %v4284_v60 }
 0x197   :  { %v1431_v37 = vmax.f32 %v1267_v7, 0.0  ;;  %v55_v7 = vsub.f32 %v31_v0, %v49_v31 }
 0x198   :  { %v1432_v5 = vmax.f32 %v1269_v38, 0.0  ;;  %v1272_v22 = vpop.f32.mrb[2].mxu0  ;;  %v56_v38 = vsub.f32 %v32_v10, %v50_v26 }
 0x199   :  { %v4292_v24 = vmul.f32 %v2693_v36, %v1431_v37  ;;  %v1273_v29 = vadd.f32 %v1272_v22, %v4289_v4  ;;  %v1274_v40 = vpop.f32.mrb[3].mxu0  ;;  %vm61_vm14 = vcmp.gt.f32.partialorder %v55_v7, 0.5  ;;  %vm67_vm15 = vcmp.lt.f32.partialorder %v55_v7, 16.5 }
 0x19a   :  { %v4295_v45 = vmul.f32 %v2694_v19, %v1432_v5  ;;  %v1275_v49 = vadd.f32 %v1274_v40, %v4289_v4  ;;  %vm62_vm9 = vcmp.gt.f32.partialorder %v56_v38, 0.5  ;;  %vm68_vm10 = vcmp.lt.f32.partialorder %v56_v38, 16.5  ;;  %vm73_vm11 = vmand %vm61_vm14, %vm67_vm15 }
 0x19b   :  { %v1437_v51 = vmax.f32 %v1273_v29, 0.0  ;;  %vm74_vm12 = vmand %vm62_vm9, %vm68_vm10 }
 0x19c   :  { %v1438_v6 = vmax.f32 %v1275_v49, 0.0  ;;  %v3366_v20 = vpack.i.bf16 %v4295_v45, %v4292_v24  ;;  %v2698_v32 = vsel %vm74_vm12, 1.0, %v3670_v52 }
 0x19d   :  { %v4300_v3 = vmul.f32 %v2693_v36, %v1437_v51 }
 0x19e   :  { %v4302_v16 = vmul.f32 %v2694_v19, %v1438_v6  ;;  %3367 = vrot.lane.b32.xlu1 %v3366_v20, %s3661_s30  ;;  %3372 = vrot.lane.b32.xlu0 %v3366_v20, %s3662_s6  ;;  %v2697_v6 = vsel %vm73_vm11, 1.0, %v3670_v52 }
 0x19f   :  { %v4308_v41 = vpack.i.bf16 %v4300_v3, %v4292_v24 }
 0x1a0   :  { %v4312_v25 = vpack.i.bf16 %v4302_v16, %v4300_v3 }
 0x1a2   :  { %3377 = vrot.lane.b32.xlu1 %v3366_v20, %s3663_s7  ;;  %3382 = vrot.lane.b32.xlu0 %v3366_v20, %s3664_s12 }
 0x1c1   :  { %v1343_v15 = vpop.f32.mrb[0].mxu1 }
 0x1c2   :  { %v1344_v55 = vadd.f32 %v1343_v15, %v4284_v60  ;;  %v1345_v9 = vpop.f32.mrb[1].mxu1  ;;  %v4438_v15 = vpop.permute.xlu1 %3342 }
 0x1c3   :  { %v1346_v63 = vadd.f32 %v1345_v9, %v4284_v60 }
 0x1c4   :  { %v1433_v58 = vmax.f32 %v1344_v55, 0.0 }
 0x1c5   :  { %v1349_v54 = vpop.f32.mrb[2].mxu1  ;;  %v1434_v46 = vmax.f32 %v1346_v63, 0.0  ;;  %v4455_v63 = vpop.permute.xlu0 %3357 }
 0x1c6   :  { %v4323_v8 = vmul.f32 %v2695_v17, %v1433_v58  ;;  %v1350_v30 = vadd.f32 %v1349_v54, %v4289_v4  ;;  %v1351_v33 = vpop.f32.mrb[3].mxu1  ;;  %v4444_v9 = vpop.permute.xlu1 %3352  ;;  %v2403_v54 = vld [vmem:[%s5008_s4] sm:$0xff] }
 0x1c7   :  { %v1352_v57 = vadd.f32 %v1351_v33, %v4289_v4  ;;  %v4334_v13 = vmul.f32 %v2696_v23, %v1434_v46 }
 0x1c8   :  { %v1439_v11 = vmax.f32 %v1350_v30, 0.0  ;;  %v3391_v35 = vpack.i.bf16 %v4323_v8, %v4295_v45  ;;  %v2404_v30 = vld [vmem:[%s5008_s4 + $0x8] sm:$0xff] }
 0x1c9   :  { %v1440_v39 = vmax.f32 %v1352_v57, 0.0  ;;  %v3411_v29 = vpack.i.bf16 %v4334_v13, %v3670_v52 }
 0x1ca   :  { %v4330_v34 = vmul.f32 %v2695_v17, %v1439_v11  ;;  %3392 = vrot.lane.b32.xlu0 %v3391_v35, %s3666_s22  ;;  %3387 = vrot.lane.b32.xlu1 %v3391_v35, %s3665_s21  ;;  %v4453_v17 = vpop.permute.xlu1 %3362 }
 0x1cb   :  { %v4336_v36 = vmul.f32 %v2696_v23, %v1440_v39 }
 0x1cc   :  { %v3451_v37 = vpack.i.bf16 %v4330_v34, %v4323_v8  ;;  %v3486_v19 = vpack.i.bf16 %v4330_v34, %v4302_v16 }
 0x1ce   :  { %3402 = vrot.lane.b32.xlu0 %v3391_v35, %s3668_s24  ;;  %3397 = vrot.lane.b32.xlu1 %v3391_v35, %s3667_s23 }
 0x1d2   :  { %v1420_v40 = vpop.f32.mrb[4].mxu0  ;;  %3412 = vrot.lane.b32.xlu0 %v3411_v29, %s3662_s6  ;;  %3407 = vrot.lane.b32.xlu1 %v3411_v29, %s3661_s30 }
 0x1d3   :  { %v1421_v49 = vadd.f32 %v1420_v40, %v4284_v60  ;;  %v1422_v51 = vpop.f32.mrb[5].mxu0 }
 0x1d4   :  { %v1423_v20 = vadd.f32 %v1422_v51, %v4284_v60 }
 0x1d5   :  { %v1435_v53 = vmax.f32 %v1421_v49, 0.0 }
 0x1d6   :  { %v1436_v44 = vmax.f32 %v1423_v20, 0.0  ;;  %v1426_v47 = vpop.f32.mrb[6].mxu0  ;;  %3422 = vrot.lane.b32.xlu0 %v3411_v29, %s3664_s12  ;;  %3417 = vrot.lane.b32.xlu1 %v3411_v29, %s3663_s7 }
 0x1d7   :  { %v4358_v42 = vmul.f32 %v2697_v6, %v1435_v53  ;;  %v1427_v12 = vadd.f32 %v1426_v47, %v4289_v4  ;;  %v1428_v2 = vpop.f32.mrb[7].mxu0  ;;  %v3344_v53 = vunpack.i.l.bf16 %v4438_v15 }
 0x1d8   :  { %v4361_v59 = vmul.f32 %v2698_v32, %v1436_v44  ;;  %v1429_v56 = vadd.f32 %v1428_v2, %v4289_v4  ;;  %v3349_v44 = vunpack.i.l.bf16 %v4446_v50 }
 0x1d9   :  { %5022 = vst [vmem:[#allocation4_spill] sm:$0xff] %v4358_v42  ;;  %v1441_v43 = vmax.f32 %v1427_v12, 0.0  ;;  %v3531_v60 = vpack.i.bf16 %v4358_v42, %v4334_v13 }
 0x1da   :  { %5023 = vst [vmem:[#allocation5_spill] sm:$0xff] %v4361_v59  ;;  %v1442_v1 = vmax.f32 %v1429_v56, 0.0  ;;  %3432 = vrot.lane.b32.xlu0 %v4308_v41, %s3666_s22  ;;  %3427 = vrot.lane.b32.xlu1 %v4308_v41, %s3665_s21  ;;  %v3536_v14 = vpack.i.bf16 %v4361_v59, %v4358_v42  ;;  %v3556_v28 = vpack.i.bf16 %v3670_v52, %v4361_v59  ;;  %v3345_v56 = vunpack.i.h.bf16 %v4438_v15 }
 0x1db   :  { %v4372_v18 = vmul.f32 %v2697_v6, %v1441_v43 }
 0x1dc   :  { %v4374_v0 = vmul.f32 %v2698_v32, %v1442_v1  ;;  %v3355_v1 = vunpack.i.h.bf16 %v4444_v9 }
 0x1dd   :  { %5024 = vst [vmem:[#allocation6_spill] sm:$0xff] %v4372_v18  ;;  %v3566_v4 = vpack.i.bf16 %v4372_v18, %v4336_v36 }
 0x1de   :  { %5025 = vst [vmem:[#allocation7_spill] sm:$0xff] %v4374_v0  ;;  %3442 = vrot.lane.b32.xlu0 %v4308_v41, %s3668_s24  ;;  %3437 = vrot.lane.b32.xlu1 %v4308_v41, %s3667_s23  ;;  %v3571_v10 = vpack.i.bf16 %v4374_v0, %v4372_v18  ;;  %v3511_v41 = vpack.i.bf16 %v4336_v36, %v3670_v52 }
 0x1df   :  { %v3621_v55 = vpack.i.bf16 %v3670_v52, %v4374_v0 }
 0x1e2   :  { %3452 = vrot.lane.b32.xlu0 %v3451_v37, %s3662_s6  ;;  %3447 = vrot.lane.b32.xlu1 %v3451_v37, %s3661_s30 }
 0x1e6   :  { %3462 = vrot.lane.b32.xlu0 %v3451_v37, %s3664_s12  ;;  %3457 = vrot.lane.b32.xlu1 %v3451_v37, %s3663_s7 }
 0x1ea   :  { %3467 = vrot.lane.b32.xlu0 %v4312_v25, %s3661_s30  ;;  %3472 = vrot.lane.b32.xlu1 %v4312_v25, %s3662_s6 }
 0x1ee   :  { %3477 = vrot.lane.b32.xlu0 %v4312_v25, %s3663_s7  ;;  %3482 = vrot.lane.b32.xlu1 %v4312_v25, %s3664_s12  ;;  %v4417_v25 = vld [vmem:[%s5007_s3 + $0x8] sm:$0xff] }
 0x1ef   :  { %5026 = vst [vmem:[#allocation8_spill] sm:$0xff] %v4417_v25  ;;  %2775 = vmatprep.mubr.msk.f32.mxu1 %vm1193_vm0, %v4417_v25  ;;  %2777 = vmatprep.mubr.msk.f32.mxu0 %vm1193_vm0, %v4417_v25 }
 0x1f2   :  { %3487 = vrot.lane.b32.xlu0 %v3486_v19, %s3665_s21  ;;  %3492 = vrot.lane.b32.xlu1 %v3486_v19, %s3666_s22 }
 0x1f6   :  { %3497 = vrot.lane.b32.xlu0 %v3486_v19, %s3667_s23  ;;  %3502 = vrot.lane.b32.xlu1 %v3486_v19, %s3668_s24 }
 0x1fa   :  { %3512 = vrot.lane.b32.xlu0 %v3511_v41, %s3662_s6  ;;  %3507 = vrot.lane.b32.xlu1 %v3511_v41, %s3661_s30 }
 0x1fe   :  { %3522 = vrot.lane.b32.xlu0 %v3511_v41, %s3664_s12  ;;  %3517 = vrot.lane.b32.xlu1 %v3511_v41, %s3663_s7 }
 0x202   :  { %3532 = vrot.lane.b32.xlu0 %v3531_v60, %s3666_s22  ;;  %3527 = vrot.lane.b32.xlu1 %v3531_v60, %s3665_s21 }
 0x206   :  { %3537 = vrot.lane.b32.xlu0 %v3536_v14, %s3661_s30  ;;  %3542 = vrot.lane.b32.xlu1 %v3536_v14, %s3662_s6 }
 0x20a   :  { %3547 = vrot.lane.b32.xlu0 %v3536_v14, %s3663_s7  ;;  %3552 = vrot.lane.b32.xlu1 %v3536_v14, %s3664_s12 }
 0x20e   :  { %3557 = vrot.lane.b32.xlu0 %v3556_v28, %s3665_s21  ;;  %3562 = vrot.lane.b32.xlu1 %v3556_v28, %s3666_s22 }
 0x210   :  { %v4459_v21 = vpop.permute.xlu1 %3367  ;;  %v4461_v58 = vpop.permute.xlu0 %3372 }
 0x211   :  { %v3369_v47 = vunpack.i.l.bf16 %v4459_v21  ;;  %v3374_v12 = vunpack.i.l.bf16 %v4461_v58  ;;  %v5011_v43 = vunpack.i.h.bf16 %v4459_v21 }
 0x212   :  { %3572 = vrot.lane.b32.xlu0 %v3571_v10, %s3661_s30  ;;  %3567 = vrot.lane.b32.xlu1 %v3566_v4, %s3665_s21 }
 0x213   :  { %v1499_v61 = vsel %vm136_vm1, %v3344_v53, %v3369_v47  ;;  %v1549_v62 = vsel %vm195_vm2, %v3349_v44, %v3374_v12 }
 0x214   :  { %v4473_v33 = vpop.permute.xlu1 %3377  ;;  %v4475_v31 = vpop.permute.xlu0 %3382 }
 0x216   :  { %3577 = vrot.lane.b32.xlu0 %v3566_v4, %s3666_s22  ;;  %3582 = vrot.lane.b32.xlu1 %v3571_v10, %s3662_s6 }
 0x21a   :  { %3587 = vrot.lane.b32.xlu0 %v3571_v10, %s3663_s7  ;;  %3597 = vrot.lane.b32.xlu1 %v3531_v60, %s3667_s23 }
 0x21e   :  { %3592 = vrot.lane.b32.xlu0 %v3670_v52, %s3666_s22  ;;  %3607 = vrot.lane.b32.xlu1 %v3571_v10, %s3664_s12 }
 0x222   :  { %3602 = vrot.lane.b32.xlu0 %v3556_v28, %s3667_s23  ;;  %3612 = vrot.lane.b32.xlu1 %v3566_v4, %s3667_s23 }
 0x226   :  { %3622 = vrot.lane.b32.xlu0 %v3621_v55, %s3665_s21  ;;  %3617 = vrot.lane.b32.xlu1 %v3670_v52, %s3667_s23 }
 0x22a   :  { %3627 = vrot.lane.b32.xlu0 %v3531_v60, %s3668_s24  ;;  %3632 = vrot.lane.b32.xlu1 %v3621_v55, %s3666_s22  ;;  %v5012_v60 = vunpack.i.h.bf16 %v4461_v58 }
 0x22e   :  { %3642 = vrot.lane.b32.xlu0 %v3621_v55, %s3667_s23  ;;  %3637 = vrot.lane.b32.xlu1 %v3556_v28, %s3668_s24  ;;  %v3354_v28 = vunpack.i.l.bf16 %v4444_v9  ;;  %v3379_v9 = vunpack.i.l.bf16 %v4473_v33 }
 0x230   :  { %v1599_v42 = vsel %vm254_vm3, %v3354_v28, %v3379_v9 }
 0x232   :  { %3647 = vrot.lane.b32.xlu0 %v3566_v4, %s3668_s24  ;;  %3652 = vrot.lane.b32.xlu1 %v3621_v55, %s3668_s24  ;;  %v3350_v55 = vunpack.i.h.bf16 %v4446_v50  ;;  %v1500_v50 = vsel %vm136_vm1, %v3369_v47, %v5011_v43  ;;  %v3384_v47 = vunpack.i.l.bf16 %v4475_v31 }
 0x236   :  { %3657 = vrot.lane.b32.xlu0 %v3670_v52, %s3668_s24  ;;  %2407 = vperm.xlu1 %3340, %v2403_v54  }
 0x23a   :  { %2412 = vperm.xlu0 %3339, %v2404_v30   ;;  %v3359_v30 = vunpack.i.l.bf16 %v4455_v63 }
 0x23c   :  { %v4477_v23 = vpop.permute.xlu0 %3392  ;;  %v4479_v46 = vpop.permute.xlu1 %3387 }
 0x240   :  { %v4481_v57 = vpop.permute.xlu0 %3402  ;;  %v4483_v26 = vpop.permute.xlu1 %3397 }
 0x244   :  { %v4485_v11 = vpop.permute.xlu0 %3412  ;;  %v4487_v52 = vpop.permute.xlu1 %3407 }
 0x245   :  { %5027 = vst [vmem:[#allocation9_spill] sm:$0xff] %v4485_v11  ;;  %v3414_v53 = vunpack.i.l.bf16 %v4485_v11  ;;  %v3409_v18 = vunpack.i.l.bf16 %v4487_v52 }
 0x248   :  { %v4489_v35 = vpop.permute.xlu0 %3422  ;;  %v4491_v39 = vpop.permute.xlu1 %3417 }
 0x24c   :  { %v4493_v7 = vpop.permute.xlu0 %3432  ;;  %v4495_v38 = vpop.permute.xlu1 %3427 }
 0x250   :  { %v4497_v37 = vpop.permute.xlu0 %3442  ;;  %v4499_v19 = vpop.permute.xlu1 %3437 }
 0x254   :  { %v4501_v29 = vpop.permute.xlu0 %3452  ;;  %v4503_v40 = vpop.permute.xlu1 %3447 }
 0x258   :  { %v4505_v49 = vpop.permute.xlu0 %3462  ;;  %v4507_v51 = vpop.permute.xlu1 %3457 }
 0x25c   :  { %v4509_v6 = vpop.permute.xlu0 %3467  ;;  %v4511_v20 = vpop.permute.xlu1 %3472 }
 0x25d   :  { %v3469_v32 = vunpack.i.l.bf16 %v4509_v6  ;;  %v5010_v2 = vunpack.i.h.bf16 %v4509_v6  ;;  %v5014_v14 = vunpack.i.h.bf16 %v4511_v20  ;;  %v3474_v4 = vunpack.i.l.bf16 %v4511_v20 }
 0x25f   :  { %v1502_v54 = vsel %vm136_vm1, %v3345_v56, %v3469_v32  ;;  %v1503_v22 = vsel %vm136_vm1, %v3469_v32, %v5010_v2  ;;  %v1550_v56 = vsel %vm195_vm2, %v3374_v12, %v5012_v60  ;;  %v1553_v2 = vsel %vm195_vm2, %v3474_v4, %v5014_v14 }
 0x260   :  { %v4525_v10 = vpop.permute.xlu0 %3477  ;;  %v4527_v41 = vpop.permute.xlu1 %3482  ;;  %v2903_v48 = vpack.c.bf16 %v1502_v54, %v1499_v61  ;;  %v2901_v12 = vpack.c.bf16 %v1503_v22, %v1500_v50  ;;  %v5016_v54 = vunpack.i.h.bf16 %v4479_v46  ;;  %v1552_v14 = vsel %vm195_vm2, %v3350_v55, %v3474_v4 }
 0x261   :  { %v3479_v44 = vunpack.i.l.bf16 %v4525_v10  ;;  %v2905_v15 = vpack.c.bf16 %v1553_v2, %v1550_v56  ;;  %v3484_v50 = vunpack.i.l.bf16 %v4527_v41  ;;  %v5028_v5 = vunpack.i.h.bf16 %v4525_v10 }
 0x262   :  { %2902 = vmatprep.subr.bf16.mxu1 %v2901_v12  ;;  %v1649_v4 = vsel %vm313_vm4, %v3359_v30, %v3384_v47  ;;  %v5029_v2 = vunpack.i.h.bf16 %v4473_v33  ;;  %v5030_v56 = vunpack.i.h.bf16 %v4475_v31  ;;  %v2907_v22 = vpack.c.bf16 %v1552_v14, %v1549_v62 }
 0x263   :  { %2904 = vmatpush1.bf16.msra.mxu1 %v2903_v48  ;;  %v1603_v60 = vsel %vm254_vm3, %v3479_v44, %v5028_v5  ;;  %v5031_v5 = vunpack.i.l.bf16 %v4479_v46  ;;  %v5033_v30 = vunpack.i.l.bf16 %v4477_v23  ;;  %v1602_v62 = vsel %vm254_vm3, %v3355_v1, %v3479_v44 }
 0x264   :  { %v4549_v27 = vpop.permute.xlu0 %3487  ;;  %v4551_v32 = vpop.permute.xlu1 %3492  ;;  %2906 = vmatprep.subr.bf16.mxu1 %v2905_v15  ;;  %v1600_v55 = vsel %vm254_vm3, %v3379_v9, %v5029_v2  ;;  %v1650_v48 = vsel %vm313_vm4, %v3384_v47, %v5030_v56  ;;  %v5032_v15 = vunpack.i.h.bf16 %v4477_v23  ;;  %v5037_v47 = vunpack.i.h.bf16 %v4485_v11 }
 0x265   :  { %v4590_v28 = vsel %vm390_vm5, %v5031_v5, %v5016_v54  ;;  %v2909_v14 = vpack.c.bf16 %v1603_v60, %v1600_v55  ;;  %v5035_v54 = vunpack.i.h.bf16 %v4527_v41  ;;  %v3450_v2 = vunpack.i.h.bf16 %v4503_v40 }
 0x266   :  { %v4597_v9 = vsel %vm449_vm6, %v5033_v30, %v5032_v15  ;;  %v5036_v15 = vunpack.i.h.bf16 %v4487_v52  ;;  %v1961_v1 = vsel %vm195_vm2, %v3414_v53, %v5037_v47  ;;  %v2911_v56 = vpack.c.bf16 %v1602_v62, %v1599_v42 }
 0x267   :  { %2908 = vmatpush1.bf16.msra.mxu1 %v2907_v22  ;;  %v1653_v59 = vsel %vm313_vm4, %v3484_v50, %v5035_v54  ;;  %v3449_v54 = vunpack.i.l.bf16 %v4503_v40  ;;  %v3419_v53 = vunpack.i.l.bf16 %v4491_v39  ;;  %v5038_v47 = vunpack.i.h.bf16 %v4455_v63 }
 0x268   :  { %v4569_v61 = vpop.permute.xlu0 %3497  ;;  %v4571_v43 = vpop.permute.xlu1 %3502  ;;  %v1911_v30 = vsel %vm136_vm1, %v3409_v18, %v5036_v15  ;;  %2910 = vmatprep.subr.bf16.mxu1 %v2909_v14  ;;  %v2913_v60 = vpack.c.bf16 %v1653_v59, %v1650_v48  ;;  %v5039_v44 = vunpack.i.h.bf16 %v4509_v6  ;;  %v3489_v40 = vunpack.i.l.bf16 %v4549_v27 }
 0x269   :  { %v1652_v14 = vsel %vm313_vm4, %v5038_v47, %v3484_v50  ;;  %v3455_v50 = vunpack.i.h.bf16 %v4501_v29  ;;  %v5043_v59 = vunpack.i.h.bf16 %v4511_v20 }
 0x26a   :  { %v1504_v55 = vsel %vm136_vm1, %v5039_v44, %v3450_v2  ;;  %v5042_v44 = vunpack.i.h.bf16 %v4459_v21  ;;  %v2915_v0 = vpack.c.bf16 %v1652_v14, %v1649_v4  ;;  %v5044_v4 = vunpack.i.h.bf16 %v4549_v27 }
 0x26b   :  { %2912 = vmatpush1.bf16.msra.mxu1 %v2911_v56  ;;  %v3454_v56 = vunpack.i.l.bf16 %v4501_v29  ;;  %v1554_v11 = vsel %vm195_vm2, %v5043_v59, %v3455_v50  ;;  %v5045_v14 = vpack.c.bf16 %v4302_v16, %v4295_v45  ;;  %v5047_v50 = vunpack.i.h.bf16 %v4461_v58 }
 0x26c   :  { %v4603_v12 = vpop.permute.xlu0 %3512  ;;  %v4605_v5 = vpop.permute.xlu1 %3507  ;;  %2914 = vmatprep.subr.bf16.mxu1 %v2913_v60  ;;  %v1501_v47 = vsel %vm136_vm1, %v5042_v44, %v3449_v54  ;;  %v3429_v60 = vunpack.i.l.bf16 %v4495_v38  ;;  %v3459_v59 = vunpack.i.l.bf16 %v4507_v51  ;;  %v5049_v16 = vunpack.i.h.bf16 %v4525_v10 }
 0x26d   :  { %5034 = vst [vmem:[#allocation10_spill] sm:$0xff] %v4603_v12  ;;  %v3514_v22 = vunpack.i.l.bf16 %v4603_v12  ;;  %v3509_v18 = vunpack.i.l.bf16 %v4605_v5  ;;  %v5040_v15 = vunpack.i.h.bf16 %v4605_v5  ;;  %v5041_v48 = vunpack.i.h.bf16 %v4603_v12 }
 0x26e   :  { %v3495_v12 = vunpack.i.h.bf16 %v4551_v32  ;;  %v3500_v58 = vunpack.i.h.bf16 %v4569_v61 }
 0x26f   :  { %v1914_v63 = vsel %vm136_vm1, %v3509_v18, %v5040_v15  ;;  %v1964_v2 = vsel %vm195_vm2, %v3514_v22, %v5041_v48  ;;  %v3430_v18 = vunpack.i.h.bf16 %v4495_v38  ;;  %v2939_v15 = vpack.c.bf16 %v1504_v55, %v1501_v47  ;;  %2916 = vmatpush1.bf16.msra.mxu1 %v2915_v0 }
 0x270   :  { %v4633_v42 = vpop.permute.xlu0 %3522  ;;  %v4635_v62 = vpop.permute.xlu1 %3517  ;;  %v2937_v25 = vpack.c.bf16 %v1914_v63, %v1911_v30  ;;  %v3494_v22 = vunpack.i.l.bf16 %v4551_v32  ;;  %v1715_v30 = vsel %vm390_vm5, %v3489_v40, %v5044_v4  ;;  %v2941_v38 = vpack.c.bf16 %v1964_v2, %v1961_v1  ;;  %2918 = vmatprep.subr.bf16.mxu1 %v5045_v14 }
 0x271   :  { %v3519_v6 = vunpack.i.l.bf16 %v4635_v62  ;;  %v3460_v55 = vunpack.i.h.bf16 %v4507_v51  ;;  %v3525_v20 = vunpack.i.h.bf16 %v4633_v42  ;;  %v3524_v54 = vunpack.i.l.bf16 %v4633_v42 }
 0x272   :  { %2938 = vmatprep.subr.bf16.mxu0 %v2937_v25  ;;  %v5046_v0 = vunpack.i.h.bf16 %v4635_v62  ;;  %v3435_v63 = vunpack.i.h.bf16 %v4493_v7  ;;  %v1551_v1 = vsel %vm195_vm2, %v5047_v50, %v3454_v56  ;;  %v5048_v48 = vunpack.i.h.bf16 %v4491_v39 }
 0x273   :  { %2940 = vmatpush1.bf16.msra.mxu0 %v2939_v15  ;;  %v2943_v45 = vpack.c.bf16 %v1554_v11, %v1551_v1  ;;  %v1604_v44 = vsel %vm254_vm3, %v5049_v16, %v3460_v55  ;;  %v2921_v47 = vpack.c.bf16 %v1715_v30, %v4590_v28  ;;  %v3499_v56 = vunpack.i.l.bf16 %v4569_v61 }
 0x274   :  { %v4657_v21 = vpop.permute.xlu0 %3532  ;;  %v4659_v29 = vpop.permute.xlu1 %3527  ;;  %v2014_v25 = vsel %vm254_vm3, %v3519_v6, %v5046_v0  ;;  %2942 = vmatprep.subr.bf16.mxu0 %v2941_v38  ;;  %v2011_v2 = vsel %vm254_vm3, %v3419_v53, %v5048_v48  ;;  %v1714_v6 = vsel %vm390_vm5, %v3430_v18, %v3489_v40  ;;  %v5050_v51 = vpack.c.bf16 %v4300_v3, %v4292_v24 }
 0x275   :  { %v1765_v11 = vsel %vm449_vm6, %v3494_v22, %v3495_v12  ;;  %v2945_v10 = vpack.c.bf16 %v2014_v25, %v2011_v2  ;;  %v3434_v40 = vunpack.i.l.bf16 %v4493_v7  ;;  %v5051_v28 = vunpack.i.l.bf16 %v4479_v46 }
 0x276   :  { %2920 = vmatpush1.bf16.msra.mxu1 %v5050_v51  ;;  %v3465_v4 = vunpack.i.h.bf16 %v4505_v49  ;;  %v2064_v24 = vsel %vm313_vm4, %v3524_v54, %v3525_v20  ;;  %v3464_v3 = vunpack.i.l.bf16 %v4505_v49  ;;  %v5052_v30 = vunpack.i.h.bf16 %v4473_v33 }
 0x277   :  { %v1711_v18 = vsel %vm390_vm5, %v3429_v60, %v5051_v28  ;;  %2922 = vmatprep.subr.bf16.mxu1 %v2921_v47  ;;  %2944 = vmatpush1.bf16.msra.mxu0 %v2943_v45  ;;  %v5053_v7 = vunpack.i.h.bf16 %v4489_v35  ;;  %v5054_v60 = vunpack.i.l.bf16 %v4489_v35  ;;  %v5055_v25 = vunpack.i.h.bf16 %v4527_v41 }
 0x278   :  { %v4691_v15 = vpop.permute.xlu0 %3537  ;;  %v4693_v53 = vpop.permute.xlu1 %3542  ;;  %v1601_v38 = vsel %vm254_vm3, %v5052_v30, %v3459_v59  ;;  %v2923_v55 = vpack.c.bf16 %v1714_v6, %v1711_v18  ;;  %2946 = vmatprep.subr.bf16.mxu0 %v2945_v10  ;;  %v1764_v54 = vsel %vm449_vm6, %v3435_v63, %v3494_v22  ;;  %v2925_v49 = vpack.c.bf16 %v1765_v11, %v4597_v9 }
 0x279   :  { %v2061_v14 = vsel %vm313_vm4, %v5054_v60, %v5053_v7  ;;  %v2947_v0 = vpack.c.bf16 %v1604_v44, %v1601_v38  ;;  %v1654_v50 = vsel %vm313_vm4, %v5055_v25, %v3465_v4  ;;  %v3505_v33 = vunpack.i.h.bf16 %v4571_v43 }
 0x27a   :  { %v3504_v1 = vunpack.i.l.bf16 %v4571_v43  ;;  %2924 = vmatpush1.bf16.msra.mxu1 %v2923_v55  ;;  %v1815_v2 = vsel %vm508_vm7, %v3499_v56, %v3500_v58  ;;  %v2949_v41 = vpack.c.bf16 %v2064_v24, %v2061_v14  ;;  %v3404_v45 = vunpack.i.l.bf16 %v4481_v57 }
 0x27b   :  { %v5056_v22 = vunpack.i.l.bf16 %v4477_v23  ;;  %v3440_v63 = vunpack.i.h.bf16 %v4499_v19  ;;  %v3439_v16 = vunpack.i.l.bf16 %v4499_v19  ;;  %2926 = vmatprep.subr.bf16.mxu1 %v2925_v49  ;;  %2948 = vmatpush1.bf16.msra.mxu0 %v2947_v0  ;;  %v3445_v44 = vunpack.i.h.bf16 %v4497_v37 }
 0x27c   :  { %v4722_v59 = vpop.permute.xlu0 %3547  ;;  %v4724_v48 = vpop.permute.xlu1 %3552  ;;  %v5057_v6 = vunpack.i.h.bf16 %v4475_v31  ;;  %v5058_v11 = vunpack.i.h.bf16 %v4483_v26  ;;  %v5059_v10 = vunpack.i.l.bf16 %v4483_v26  ;;  %2950 = vmatprep.subr.bf16.mxu0 %v2949_v41  ;;  %v3365_v24 = vunpack.i.h.bf16 %v4453_v17 }
 0x27d   :  { %v1761_v9 = vsel %vm449_vm6, %v3434_v40, %v5056_v22  ;;  %v3444_v40 = vunpack.i.l.bf16 %v4497_v37  ;;  %v1814_v19 = vsel %vm508_vm7, %v3440_v63, %v3499_v56  ;;  %v1865_v30 = vsel %vm567_vm8, %v3504_v1, %v3505_v33 }
 0x27e   :  { %v1651_v47 = vsel %vm313_vm4, %v5057_v6, %v3464_v3  ;;  %v2927_v51 = vpack.c.bf16 %v1764_v54, %v1761_v9  ;;  %v1812_v28 = vsel %vm508_vm7, %v5059_v10, %v5058_v11  ;;  %v3364_v38 = vunpack.i.l.bf16 %v4453_v17 }
 0x27f   :  { %v2951_v18 = vpack.c.bf16 %v1654_v50, %v1651_v47  ;;  %v2929_v4 = vpack.c.bf16 %v1815_v2, %v1812_v28  ;;  %v5060_v55 = vmov %v5059_v10  ;;  %v1864_v56 = vsel %vm567_vm8, %v3445_v44, %v3504_v1 }
 0x280   :  { %2928 = vmatpush1.bf16.msra.mxu1 %v2927_v51  ;;  %v4747_v31 = vpop.permute.xlu0 %3557  ;;  %v4749_v3 = vpop.permute.xlu1 %3562  ;;  %v1811_v37 = vsel %vm508_vm7, %v3439_v16, %v5060_v55  ;;  %v5061_v7 = vunpack.i.h.bf16 %v4481_v57  ;;  %v3530_v0 = vunpack.i.h.bf16 %v4659_v29  ;;  %v3529_v25 = vunpack.i.l.bf16 %v4659_v29 }
 0x281   :  { %2930 = vmatprep.subr.bf16.mxu1 %v2929_v4  ;;  %2952 = vmatpush1.bf16.msra.mxu0 %v2951_v18  ;;  %v2931_v14 = vpack.c.bf16 %v1814_v19, %v1811_v37  ;;  %v3539_v50 = vunpack.i.l.bf16 %v4691_v15  ;;  %v5062_v17 = vpack.c.bf16 %v4336_v36, %v4334_v13  ;;  %v5063_v54 = vunpack.i.h.bf16 %v4479_v46 }
 0x282   :  { %v1862_v60 = vsel %vm567_vm8, %v3404_v45, %v5061_v7  ;;  %v1861_v1 = vsel %vm567_vm8, %v3444_v40, %v3404_v45  ;;  %v3540_v2 = vunpack.i.h.bf16 %v4691_v15  ;;  %v5064_v22 = vunpack.i.h.bf16 %v4549_v27 }
 0x283   :  { %2954 = vmatprep.subr.bf16.mxu0 %v5062_v17  ;;  %v1713_v49 = vsel %vm390_vm5, %v5063_v54, %v3364_v38  ;;  %v2933_v41 = vpack.c.bf16 %v1865_v30, %v1862_v60  ;;  %v2935_v63 = vpack.c.bf16 %v1864_v56, %v1861_v1  ;;  %v3535_v16 = vunpack.i.h.bf16 %v4657_v21  ;;  %v4813_v60 = vld [vmem:[%s5007_s3 + $0x18] sm:$0xff] }
 0x284   :  { %v1716_v9 = vsel %vm390_vm5, %v5064_v22, %v3365_v24  ;;  %v3534_v44 = vunpack.i.l.bf16 %v4657_v21  ;;  %2932 = vmatpush1.bf16.msra.mxu1 %v2931_v14  ;;  %v3573_v13 = vpop.permute.xlu0 %3572  ;;  %v4778_v36 = vpop.permute.xlu1 %3567  ;;  %v5065_v46 = vpack.c.bf16 %v4330_v34, %v4323_v8  ;;  %v5066_v47 = vunpack.i.h.bf16 %v4487_v52  ;;  %v5068_v14 = vld [vmem:[#allocation9_spill] sm:$0xff] }
 0x285   :  { %2934 = vmatprep.subr.bf16.mxu1 %v2933_v41  ;;  %v3575_v15 = vunpack.i.h.bf16 %v3573_v13  ;;  %v3574_v45 = vunpack.i.l.bf16 %v3573_v13  ;;  %v3570_v27 = vunpack.i.h.bf16 %v4778_v36  ;;  %v3569_v6 = vunpack.i.l.bf16 %v4778_v36 }
 0x286   :  { %2956 = vmatpush1.bf16.msra.mxu0 %v5065_v46  ;;  %v1912_v51 = vsel %vm136_vm1, %v5066_v47, %v3539_v50  ;;  %v3545_v11 = vunpack.i.h.bf16 %v4693_v53  ;;  %v3544_v10 = vunpack.i.l.bf16 %v4693_v53  ;;  %v2123_v28 = vsel %vm390_vm5, %v3529_v25, %v3530_v0  ;;  %v4804_v53 = vld [vmem:[%s5007_s3] sm:$0xff] }
 0x287   :  { %v5067_v8 = vunpack.i.h.bf16 %v4605_v5  ;;  %v2126_v40 = vsel %vm390_vm5, %v3569_v6, %v3570_v27  ;;  %v1913_v52 = vsel %vm136_vm1, %v3539_v50, %v3540_v2  ;;  %v1916_v18 = vsel %vm136_vm1, %v3574_v45, %v3575_v15  ;;  %v5070_v2 = vld [vmem:[#allocation10_spill] sm:$0xff] }
 0x288   :  { %v2959_v19 = vpack.c.bf16 %v1716_v9, %v1713_v49  ;;  %2936 = vmatpush1.bf16.msra.mxu1 %v2935_v63  ;;  %v4806_v24 = vpop.permute.xlu0 %3577  ;;  %v3583_v5 = vpop.permute.xlu1 %3582  ;;  %v2957_v30 = vpack.c.bf16 %v2126_v40, %v2123_v28  ;;  %v2973_v38 = vpack.c.bf16 %v1916_v18, %v1913_v52  ;;  %v5069_v25 = vunpack.i.h.bf16 %v5068_v14 }
 0x289   :  { %v1915_v34 = vsel %vm136_vm1, %v5067_v8, %v3574_v45  ;;  %v3580_v55 = vunpack.i.h.bf16 %v4806_v24  ;;  %v3579_v37 = vunpack.i.l.bf16 %v4806_v24  ;;  %v3585_v56 = vunpack.i.h.bf16 %v3583_v5 }
 0x28a   :  { %v2975_v4 = vpack.c.bf16 %v1915_v34, %v1912_v51  ;;  %v3584_v7 = vunpack.i.l.bf16 %v3583_v5  ;;  %v1962_v50 = vsel %vm195_vm2, %v5069_v25, %v3544_v10  ;;  %v3550_v17 = vunpack.i.h.bf16 %v4722_v59  ;;  %2958 = vmatprep.subr.bf16.mxu0 %v2957_v30  ;;  %2974 = vmatprep.subr.bf16.mxu1 %v2973_v38  ;;  %v5074_v5 = vld [vmem:[#allocation8_spill] sm:$0xff] }
 0x28b   :  { %v2173_v54 = vsel %vm449_vm6, %v3534_v44, %v3535_v16  ;;  %v1963_v49 = vsel %vm195_vm2, %v3544_v10, %v3545_v11  ;;  %v3549_v1 = vunpack.i.l.bf16 %v4722_v59  ;;  %2486 = vmatmul.mubr.f32.vlgmr.msra.gmra.mrb[4].mxu1 %v4804_v53  ;;  %v5071_v41 = vunpack.i.h.bf16 %v5070_v2  ;;  %2960 = vmatpush1.bf16.msra.mxu0 %v2959_v19  ;;  %v4837_v59 = vld [vmem:[%s5007_s3 + $0x10] sm:$0xff] }
 0x28c   :  { %v2176_v9 = vsel %vm449_vm6, %v3579_v37, %v3580_v55  ;;  %v1966_v63 = vsel %vm195_vm2, %v3584_v7, %v3585_v56  ;;  %2776 = vmatprep.mubr.msk.f32.mxu1 %vm1193_vm0, %v4813_v60  ;;  %2976 = vmatpush1.bf16.msra.mxu1 %v2975_v4  ;;  %v3588_v44 = vpop.permute.xlu0 %3587  ;;  %v4839_v46 = vpop.permute.xlu1 %3597  ;;  %v3555_v51 = vunpack.i.h.bf16 %v4724_v48  ;;  %v3554_v11 = vunpack.i.l.bf16 %v4724_v48 }
 0x28d   :  { %v1965_v22 = vsel %vm195_vm2, %v5071_v41, %v3584_v7  ;;  %v2961_v15 = vpack.c.bf16 %v2176_v9, %v2173_v54  ;;  %v2977_v45 = vpack.c.bf16 %v1966_v63, %v1963_v49  ;;  %v3590_v6 = vunpack.i.h.bf16 %v3588_v44 }
 0x28e   :  { %v2979_v13 = vpack.c.bf16 %v1965_v22, %v1962_v50  ;;  %v3589_v47 = vunpack.i.l.bf16 %v3588_v44  ;;  %v5072_v10 = vunpack.i.h.bf16 %v4491_v39  ;;  %v5073_v8 = vunpack.i.h.bf16 %v4635_v62 }
 0x28f   :  { %2962 = vmatprep.subr.bf16.mxu0 %v2961_v15  ;;  %2978 = vmatprep.subr.bf16.mxu1 %v2977_v45  ;;  %v2013_v40 = vsel %vm254_vm3, %v3549_v1, %v3550_v17  ;;  %v5075_v62 = vunpack.i.h.bf16 %v4489_v35  ;;  %v3600_v7 = vunpack.i.h.bf16 %v4839_v46  ;;  %v3599_v14 = vunpack.i.l.bf16 %v4839_v46 }
 0x290   :  { %v2012_v28 = vsel %vm254_vm3, %v5072_v10, %v3549_v1  ;;  %2492 = vmatmul.mubr.f32.gmra.mrb[6].mxu1 %v4837_v59  ;;  %v2015_v34 = vsel %vm254_vm3, %v5073_v8, %v3589_v47  ;;  %v2016_v52 = vsel %vm254_vm3, %v3589_v47, %v3590_v6  ;;  %v3593_v19 = vpop.permute.xlu0 %3592  ;;  %v3608_v48 = vpop.permute.xlu1 %3607  ;;  %v2063_v25 = vsel %vm313_vm4, %v3554_v11, %v3555_v51  ;;  %v5078_v10 = vld [vmem:[#allocation5_spill] sm:$0xff] }
 0x291   :  { %v2983_v18 = vpack.c.bf16 %v2015_v34, %v2012_v28  ;;  %2980 = vmatpush1.bf16.msra.mxu1 %v2979_v13  ;;  %v2981_v4 = vpack.c.bf16 %v2016_v52, %v2013_v40  ;;  %2779 = vmatprep.mubr.msk.f32.mxu1 %vm1193_vm0, %v5074_v5  ;;  %v3595_v39 = vunpack.i.h.bf16 %v3593_v19  ;;  %v3594_v30 = vunpack.i.l.bf16 %v3593_v19  ;;  %v5082_v5 = vld [vmem:[#allocation4_spill] sm:$0xff] }
 0x292   :  { %v3610_v38 = vunpack.i.h.bf16 %v3608_v48  ;;  %v3609_v37 = vunpack.i.l.bf16 %v3608_v48  ;;  %v2062_v56 = vsel %vm313_vm4, %v5075_v62, %v3554_v11  ;;  %v5076_v50 = vunpack.i.h.bf16 %v4477_v23  ;;  %v5077_v11 = vld [vmem:[#allocation7_spill] sm:$0xff] }
 0x293   :  { %2982 = vmatprep.subr.bf16.mxu1 %v2981_v4  ;;  %v1766_v54 = vsel %vm449_vm6, %v3495_v12, %v3595_v39  ;;  %v3560_v13 = vunpack.i.h.bf16 %v4747_v31  ;;  %v3559_v32 = vunpack.i.l.bf16 %v4747_v31  ;;  %v2223_v12 = vsel %vm508_vm7, %v3599_v14, %v3600_v7 }
 0x294   :  { %v1763_v17 = vsel %vm449_vm6, %v5076_v50, %v3594_v30  ;;  %v2065_v35 = vsel %vm313_vm4, %v3525_v20, %v3609_v37  ;;  %v2066_v49 = vsel %vm313_vm4, %v3609_v37, %v3610_v38  ;;  %v3603_v41 = vpop.permute.xlu0 %3602  ;;  %v3613_v22 = vpop.permute.xlu1 %3612  ;;  %v5079_v28 = vpack.c.bf16 %v5077_v11, %v5078_v10 }
 0x295   :  { %v2963_v1 = vpack.c.bf16 %v1766_v54, %v1763_v17  ;;  %v2987_v2 = vpack.c.bf16 %v2065_v35, %v2062_v56  ;;  %2984 = vmatpush1.bf16.msra.mxu1 %v2983_v18  ;;  %v2985_v9 = vpack.c.bf16 %v2066_v49, %v2063_v25  ;;  %v3615_v63 = vunpack.i.h.bf16 %v3613_v22 }
 0x296   :  { %v3614_v23 = vunpack.i.l.bf16 %v3613_v22  ;;  %v2124_v31 = vsel %vm390_vm5, %v3530_v0, %v3559_v32  ;;  %v3565_v8 = vunpack.i.h.bf16 %v4749_v3  ;;  %v3564_v34 = vunpack.i.l.bf16 %v4749_v3  ;;  %v5081_v3 = vld [vmem:[#allocation6_spill] sm:$0xff] }
 0x297   :  { %2964 = vmatpush1.bf16.msra.mxu0 %v2963_v1  ;;  %2986 = vmatprep.subr.bf16.mxu1 %v2985_v9  ;;  %v2125_v40 = vsel %vm390_vm5, %v3559_v32, %v3560_v13  ;;  %v5080_v19 = vunpack.i.h.bf16 %v4483_v26  ;;  %v5083_v39 = vpack.c.bf16 %v5081_v3, %v5082_v5  ;;  %v3604_v26 = vunpack.i.l.bf16 %v3603_v41 }
 0x298   :  { %v2226_v42 = vsel %vm508_vm7, %v3614_v23, %v3615_v63  ;;  %v3623_v20 = vpop.permute.xlu0 %3622  ;;  %v3618_v44 = vpop.permute.xlu1 %3617  ;;  %v2174_v61 = vsel %vm449_vm6, %v3535_v16, %v3564_v34  ;;  %v2175_v56 = vsel %vm449_vm6, %v3564_v34, %v3565_v8  ;;  %v5084_v8 = vunpack.i.h.bf16 %v4481_v57 }
 0x299   :  { %2988 = vmatpush1.bf16.msra.mxu1 %v2987_v2  ;;  %v2965_v15 = vpack.c.bf16 %v2226_v42, %v2223_v12  ;;  %v3625_v45 = vunpack.i.h.bf16 %v3623_v20  ;;  %v3624_v6 = vunpack.i.l.bf16 %v3623_v20  ;;  %v3620_v47 = vunpack.i.h.bf16 %v3618_v44 }
 0x29a   :  { %v3619_v51 = vunpack.i.l.bf16 %v3618_v44  ;;  %2990 = vmatprep.subr.bf16.mxu1 %v5079_v28  ;;  %v2224_v16 = vsel %vm508_vm7, %v3600_v7, %v3604_v26 }
 0x29b   :  { %2966 = vmatprep.subr.bf16.mxu0 %v2965_v15  ;;  %v2127_v52 = vsel %vm390_vm5, %v3570_v27, %v3624_v6  ;;  %v1816_v18 = vsel %vm508_vm7, %v3500_v58, %v3620_v47  ;;  %v2128_v0 = vsel %vm390_vm5, %v3624_v6, %v3625_v45  ;;  %v3605_v58 = vunpack.i.h.bf16 %v3603_v41 }
 0x29c   :  { %v1813_v29 = vsel %vm508_vm7, %v5080_v19, %v3619_v51  ;;  %v2995_v48 = vpack.c.bf16 %v2127_v52, %v2124_v31  ;;  %v3628_v30 = vpop.permute.xlu0 %3627  ;;  %v3633_v36 = vpop.permute.xlu1 %3632  ;;  %v2993_v38 = vpack.c.bf16 %v2128_v0, %v2125_v40 }
 0x29d   :  { %v2967_v4 = vpack.c.bf16 %v1816_v18, %v1813_v29  ;;  %2992 = vmatpush1.bf16.msra.mxu1 %v5083_v39  ;;  %v3635_v27 = vunpack.i.h.bf16 %v3633_v36  ;;  %v3634_v37 = vunpack.i.l.bf16 %v3633_v36  ;;  %v3630_v49 = vunpack.i.h.bf16 %v3628_v30  ;;  %v2653_v29 = vld [vmem:[%s5004_s0 + $0x10] sm:$0xff]  ;;  %v2656_v39 = vld [vmem:[%s5004_s0 + $0x38] sm:$0xff] }
 0x29e   :  { %2994 = vmatprep.subr.bf16.mxu1 %v2993_v38  ;;  %v3629_v1 = vunpack.i.l.bf16 %v3628_v30  ;;  %v2225_v41 = vsel %vm508_vm7, %v3604_v26, %v3605_v58  ;;  %v2783_v58 = vld [vmem:[%s5004_s0 + $0x68] sm:$0xff] }
 0x29f   :  { %2968 = vmatpush1.bf16.msra.mxu0 %v2967_v4  ;;  %v2177_v62 = vsel %vm449_vm6, %v3580_v55, %v3634_v37  ;;  %v2178_v14 = vsel %vm449_vm6, %v3634_v37, %v3635_v27  ;;  %v2782_v37 = vld [vmem:[%s5004_s0 + $0x60] sm:$0xff] }
 0x2a0   :  { %v2999_v25 = vpack.c.bf16 %v2177_v62, %v2174_v61  ;;  %v3643_v50 = vpop.permute.xlu0 %3642  ;;  %v3638_v17 = vpop.permute.xlu1 %3637  ;;  %v2997_v54 = vpack.c.bf16 %v2178_v14, %v2175_v56  ;;  %v2273_v44 = vsel %vm567_vm8, %v3629_v1, %v3630_v49  ;;  %v2654_v14 = vld [vmem:[%s5004_s0 + $0x18] sm:$0xff] }
 0x2a1   :  { %2996 = vmatpush1.bf16.msra.mxu1 %v2995_v48  ;;  %v3645_v21 = vunpack.i.h.bf16 %v3643_v50  ;;  %v3644_v35 = vunpack.i.l.bf16 %v3643_v50  ;;  %v3639_v24 = vunpack.i.l.bf16 %v3638_v17  ;;  %v3640_v2 = vunpack.i.h.bf16 %v3638_v17 }
 0x2a2   :  { %2998 = vmatprep.subr.bf16.mxu1 %v2997_v54  ;;  %v2781_v54 = vld [vmem:[%s5004_s0 + $0x58] sm:$0xff] }
 0x2a3   :  { %v2227_v55 = vsel %vm508_vm7, %v3615_v63, %v3644_v35  ;;  %v2228_v22 = vsel %vm508_vm7, %v3644_v35, %v3645_v21  ;;  %v2274_v20 = vsel %vm567_vm8, %v3630_v49, %v3639_v24  ;;  %v2275_v45 = vsel %vm567_vm8, %v3639_v24, %v3640_v2  ;;  %v2785_v49 = vld [vmem:[%s5004_s0 + $0x88] sm:$0xff]  ;;  %v2786_v2 = vld [vmem:[%s5004_s0 + $0x90] sm:$0xff] }
 0x2a4   :  { %v3003_v9 = vpack.c.bf16 %v2227_v55, %v2224_v16  ;;  %v3648_v23 = vpop.permute.xlu0 %3647  ;;  %v3653_v13 = vpop.permute.xlu1 %3652  ;;  %v3001_v32 = vpack.c.bf16 %v2228_v22, %v2225_v41 }
 0x2a5   :  { %3000 = vmatpush1.bf16.msra.mxu1 %v2999_v25  ;;  %v3650_v12 = vunpack.i.h.bf16 %v3648_v23  ;;  %v3649_v46 = vunpack.i.l.bf16 %v3648_v23  ;;  %v3655_v42 = vunpack.i.h.bf16 %v3653_v13  ;;  %v3654_v7 = vunpack.i.l.bf16 %v3653_v13  ;;  %v2657_v23 = vld [vmem:[%s5004_s0 + $0x40] sm:$0xff] }
 0x2a6   :  { %3002 = vmatprep.subr.bf16.mxu1 %v3001_v32 }
 0x2a7   :  { %v2277_v63 = vsel %vm567_vm8, %v3650_v12, %v3654_v7  ;;  %v2276_v15 = vsel %vm567_vm8, %v3649_v46, %v3650_v12  ;;  %v2278_v6 = vsel %vm567_vm8, %v3654_v7, %v3655_v42  ;;  %v2784_v46 = vld [vmem:[%s5004_s0 + $0x80] sm:$0xff] }
 0x2a8   :  { %v3007_v47 = vpack.c.bf16 %v2277_v63, %v2274_v20  ;;  %v3658_v51 = vpop.permute.xlu0 %3657  ;;  %v2969_v11 = vpack.c.bf16 %v2276_v15, %v2273_v44  ;;  %v3005_v10 = vpack.c.bf16 %v2278_v6, %v2275_v45 }
 0x2a9   :  { %3004 = vmatpush1.bf16.msra.mxu1 %v3003_v9  ;;  %v3660_v28 = vunpack.i.h.bf16 %v3658_v51  ;;  %v3659_v31 = vunpack.i.l.bf16 %v3658_v51 }
 0x2aa   :  { %2970 = vmatprep.subr.bf16.mxu0 %v2969_v11  ;;  %3006 = vmatprep.subr.bf16.mxu1 %v3005_v10 }
 0x2ab   :  { %v1863_v34 = vsel %vm567_vm8, %v5084_v8, %v3659_v31  ;;  %v1866_v40 = vsel %vm567_vm8, %v3505_v33, %v3660_v28  ;;  %v2652_v33 = vld [vmem:[%s5004_s0 + $0x8] sm:$0xff] }
 0x2ac   :  { %v2971_v52 = vpack.c.bf16 %v1866_v40, %v1863_v34 }
 0x2ad   :  { %3008 = vmatpush1.bf16.msra.mxu1 %v3007_v47 }
 0x2ae   :  { %2972 = vmatpush1.bf16.msra.mxu0 %v2971_v52 }
 0x2b0   :  { %2640 = vmatmul.mubr.f32.vlgmr.msra.gmra.mrb[8].mxu1 %v4804_v53 }
 0x2b1   :  { %2780 = vmatprep.mubr.msk.f32.mxu1 %vm1193_vm0, %v4813_v60  ;;  %2563 = vmatmul.mubr.f32.vlgmr.msra.gmra.mrb[8].mxu0 %v4804_v53 }
 0x2b2   :  { %2778 = vmatprep.mubr.msk.f32.mxu0 %vm1193_vm0, %v4813_v60 }
 0x2b4   :  { %2646 = vmatmul.mubr.f32.gmra.mrb[10].mxu1 %v4837_v59 }
 0x2b5   :  { %2569 = vmatmul.mubr.f32.gmra.mrb[10].mxu0 %v4837_v59  ;;  %v2408_v57 = vpop.permute.xlu1 %2407  ;;  %v2655_v59 = vld [vmem:[%s5004_s0 + $0x30] sm:$0xff] }
 0x2b9   :  { %v2413_v48 = vpop.permute.xlu0 %2412 }
 0x35e   :  { %v2487_v43 = vpop.f32.mrb[4].mxu1 }
 0x35f   :  { %v2488_v18 = vadd.f32 %v2487_v43, %v2408_v57  ;;  %v2489_v19 = vpop.f32.mrb[5].mxu1 }
 0x360   :  { %v2490_v53 = vadd.f32 %v2489_v19, %v2408_v57 }
 0x361   :  { %v2658_v0 = vadd.f32 %v2652_v33, %v2488_v18 }
 0x362   :  { %v2659_v60 = vadd.f32 %v2653_v29, %v2490_v53 }
 0x363   :  { %v2493_v4 = vpop.f32.mrb[6].mxu1  ;;  %2664 = vst [vmem:[%s5009_s5] sm:$0xff] %v2658_v0 }
 0x364   :  { %v2494_v3 = vadd.f32 %v2493_v4, %v2413_v48  ;;  %v2495_v5 = vpop.f32.mrb[7].mxu1  ;;  %2665 = vst [vmem:[%s5009_s5 + $0x8] sm:$0xff] %v2659_v60 }
 0x365   :  { %v2496_v30 = vadd.f32 %v2495_v5, %v2413_v48 }
 0x366   :  { %v2661_v36 = vadd.f32 %v2655_v59, %v2494_v3 }
 0x367   :  { %v2662_v38 = vadd.f32 %v2656_v39, %v2496_v30 }
 0x368   :  { %2667 = vst [vmem:[%s5009_s5 + $0x18] sm:$0xff] %v2661_v36 }
 0x369   :  { %2668 = vst [vmem:[%s5009_s5 + $0x20] sm:$0xff] %v2662_v38 }
 0x383   :  { %v2641_v27 = vpop.f32.mrb[8].mxu1 }
 0x384   :  { %v2642_v61 = vadd.f32 %v2641_v27, %v2408_v57  ;;  %v2643_v26 = vpop.f32.mrb[9].mxu1  ;;  %v2564_v56 = vpop.f32.mrb[8].mxu0 }
 0x385   :  { %v2644_v62 = vadd.f32 %v2643_v26, %v2408_v57  ;;  %v2565_v50 = vadd.f32 %v2564_v56, %v2408_v57  ;;  %v2566_v17 = vpop.f32.mrb[9].mxu0 }
 0x386   :  { %v2677_v25 = vadd.f32 %v2782_v37, %v2642_v61  ;;  %v2567_v35 = vadd.f32 %v2566_v17, %v2408_v57 }
 0x387   :  { %v2678_v21 = vadd.f32 %v2783_v58, %v2644_v62  ;;  %v2647_v16 = vpop.f32.mrb[10].mxu1  ;;  %v2660_v1 = vadd.f32 %v2654_v14, %v2565_v50 }
 0x388   :  { %2788 = vst [vmem:[%s5009_s5 + $0x38] sm:$0xff] %v2677_v25  ;;  %v2648_v24 = vadd.f32 %v2647_v16, %v2413_v48  ;;  %v2649_v55 = vpop.f32.mrb[11].mxu1  ;;  %v2676_v41 = vadd.f32 %v2781_v54, %v2567_v35  ;;  %v2570_v9 = vpop.f32.mrb[10].mxu0 }
 0x389   :  { %2789 = vst [vmem:[%s5009_s5 + $0x40] sm:$0xff] %v2678_v21  ;;  %v2650_v22 = vadd.f32 %v2649_v55, %v2413_v48  ;;  %2666 = vst [vmem:[%s5009_s5 + $0x10] sm:$0xff] %v2660_v1  ;;  %v2571_v32 = vadd.f32 %v2570_v9, %v2413_v48  ;;  %v2572_v12 = vpop.f32.mrb[11].mxu0 }
 0x38a   :  { %v2680_v13 = vadd.f32 %v2785_v49, %v2648_v24  ;;  %2787 = vst [vmem:[%s5009_s5 + $0x30] sm:$0xff] %v2676_v41  ;;  %v2573_v7 = vadd.f32 %v2572_v12, %v2413_v48 }
 0x38b   :  { %v2681_v42 = vadd.f32 %v2786_v2, %v2650_v22  ;;  %v2663_v20 = vadd.f32 %v2657_v23, %v2571_v32 }
 0x38c   :  { %2791 = vst [vmem:[%s5009_s5 + $0x50] sm:$0xff] %v2680_v13  ;;  %v2679_v44 = vadd.f32 %v2784_v46, %v2573_v7 }
 0x38d   :  { %2792 = vst [vmem:[%s5009_s5 + $0x58] sm:$0xff] %v2681_v42  ;;  %2669 = vst [vmem:[%s5009_s5 + $0x28] sm:$0xff] %v2663_v20 }
 0x38e   :  { %2790 = vst [vmem:[%s5009_s5 + $0x48] sm:$0xff] %v2679_v44 }

</bundles_post_ra>
